<compile_context>
chip_gen: v7x
topology: tpu7x:2x2x1
jax: 0.10.0
libtpu: 0.0.40
codegen_flags: <defaults>
</compile_context>

<pallas_src>
import functools
import math

import jax
import jax.numpy as jnp
from jax.experimental import pallas as pl
from jax.experimental.pallas import tpu as pltpu


LANE = 128
SUBLANE = 8

_WEIGHT_KEYS = ("w_sin", "w_cos", "w_t2", "w_xs", "w_t", "w1", "w2", "w3")


def _round_up(n, m):
    return ((n + m - 1) // m) * m


def _silu(v):
    return v * jax.nn.sigmoid(v)


# -----------------------------------------------------------------------------
# Kernel
# -----------------------------------------------------------------------------
def diffusion_mlp_kernel(inp_ref, wsin_ref, wcos_ref, wt2_ref, wxs_ref, wt_ref,
                         w1_ref, w2_ref, w3_ref, b_ref, out_ref,
                         *, emb_scale, t_col):
    """inp_ref: [TB, in_pad] f32; weight refs: bf16 true-size-padded blocks;
    b_ref: [8, bmax] f32; out_ref: [TB, out_pad] f32."""
    f32 = jnp.float32
    bf16 = jnp.bfloat16

    inp = inp_ref[...]                                   # [TB, in_pad] f32
    half_pad = wsin_ref.shape[0]
    t2pad = wsin_ref.shape[1]
    tpad = wt2_ref.shape[1]
    hpad = w1_ref.shape[1]
    opad = w3_ref.shape[1]

    bias = b_ref[...]                                    # [8, bmax] f32

    def B(i, w):                                         # [1, w], broadcasts over rows
        return bias[i:i + 1, :w]

    # --- SinusoidalPosEmb restricted to the 128-lane (half_dim-padded) window.
    # Lanes >= half_dim hit zero rows of w_sin / w_cos, so their values are
    # harmless; only a tiny [1,128] exp + [TB,128] sin/cos burst is paid.
    col = jax.lax.broadcasted_iota(jnp.int32, (1, half_pad), 1).astype(f32)
    freqs = jnp.exp(col * (-emb_scale))                  # [1, half_pad]
    t = inp[:, t_col:t_col + 1]                          # [TB, 1] timestep column
    arg = t * freqs                                      # [TB, half_pad]
    sin_e = jnp.sin(arg).astype(bf16)
    cos_e = jnp.cos(arg).astype(bf16)

    # --- time MLP: (sin@Wsin + cos@Wcos + bt1) -> SiLU -> Linear ---
    h_t = _silu(
        jnp.dot(sin_e, wsin_ref[...], preferred_element_type=f32)
        + jnp.dot(cos_e, wcos_ref[...], preferred_element_type=f32)
        + B(0, t2pad))
    t_emb = jnp.dot(h_t.astype(bf16), wt2_ref[...],
                    preferred_element_type=f32) + B(1, tpad)

    # --- "concat [x, states, t_emb]" as split-weight matmul sum.
    # inp holds [x | states | t]; the t column hits a zero row of w_xs.
    h = _silu(
        jnp.dot(inp.astype(bf16), wxs_ref[...], preferred_element_type=f32)
        + jnp.dot(t_emb.astype(bf16), wt_ref[...], preferred_element_type=f32)
        + B(2, hpad))

    # --- remaining MLP layers (Dropout is identity in eval mode) ---
    h = _silu(jnp.dot(h.astype(bf16), w1_ref[...], preferred_element_type=f32) + B(3, hpad))
    h = _silu(jnp.dot(h.astype(bf16), w2_ref[...], preferred_element_type=f32) + B(4, hpad))
    out = jnp.dot(h.astype(bf16), w3_ref[...], preferred_element_type=f32) + B(5, opad)

    out_ref[...] = out.astype(out_ref.dtype)             # lane-dense full-tile store


# -----------------------------------------------------------------------------
# Parameter packing (done once, outside the hot path)
# -----------------------------------------------------------------------------
def pack_params(params, *, state_dim, action_dim, hidden_dim, time_emb_dim):
    """Pack weights as bf16 blocks at true (128-padded) sizes; biases as one
    small f32 slab.  All pad rows/cols are explicitly zero (required for the
    split-weight concat/sin-cos tricks)."""
    half_dim = time_emb_dim // 2
    xs = action_dim + state_dim

    half_rows = _round_up(max(half_dim, 1), LANE)
    t2pad = _round_up(2 * time_emb_dim, LANE)
    tpad = _round_up(time_emb_dim, LANE)
    hpad = _round_up(hidden_dim, LANE)
    in_cols = _round_up(xs + 1, LANE)          # [x | states | t]
    opad = _round_up(action_dim, LANE)

    def pad_w(a, rows, cols):
        out = jnp.zeros((rows, cols), jnp.bfloat16)
        return out.at[:a.shape[0], :a.shape[1]].set(a.astype(jnp.bfloat16))

    packed = {
        "w_sin": pad_w(params["wt1"][:half_dim], half_rows, t2pad),   # sin rows of wt1
        "w_cos": pad_w(params["wt1"][half_dim:], half_rows, t2pad),   # cos rows of wt1
        "w_t2":  pad_w(params["wt2"], t2pad, tpad),
        "w_xs":  pad_w(params["w0"][:xs], in_cols, hpad),  # row `xs` (t col) stays zero
        "w_t":   pad_w(params["w0"][xs:], tpad, hpad),
        "w1":    pad_w(params["w1"], hpad, hpad),
        "w2":    pad_w(params["w2"], hpad, hpad),
        "w3":    pad_w(params["w3"], hpad, opad),
    }

    bmax = max(t2pad, tpad, hpad, opad)

    def pad_b(b):
        out = jnp.zeros((1, bmax), jnp.float32)
        return out.at[:, :b.shape[1]].set(b.astype(jnp.float32))

    rows = [pad_b(params[k]) for k in ("bt1", "bt2", "b0", "b1", "b2", "b3")]
    rows += [jnp.zeros((1, bmax), jnp.float32)] * 2
    packed["b_slab"] = jnp.concatenate(rows, axis=0)       # [8, bmax] f32
    return packed


# -----------------------------------------------------------------------------
# Forward wrapper
# -----------------------------------------------------------------------------
def diffusion_mlp_forward(x, timesteps, states, packed, *, state_dim, action_dim,
                          time_emb_dim):
    """x: [B, action_dim], timesteps: [B], states: [B, state_dim]."""
    batch = x.shape[0]
    half_dim = time_emb_dim // 2
    emb_scale = math.log(10000.0) / max(half_dim - 1, 1)
    xs = action_dim + state_dim
    t_col = xs

    in_cols = packed["w_xs"].shape[0]
    hpad = packed["w1"].shape[0]
    t2pad = packed["w_sin"].shape[1]
    out_cols = packed["w3"].shape[1]

    # Batch tile: multiple of 8, capped at 128 rows.  Moderate/large batches then
    # give >= 2 grid steps (both v7x TCs get work via "parallel"), 128 rows
    # already saturate v5e's 128-wide MXU, and activation VMEM stays small.
    tb = min(_round_up(batch, SUBLANE), LANE)
    b_pad = _round_up(batch, tb)

    # Pack [x | states | t] into one narrow lane-dense input slab.
    inp = jnp.zeros((b_pad, in_cols), jnp.float32)
    inp = inp.at[:batch, :action_dim].set(x.astype(jnp.float32))
    inp = inp.at[:batch, action_dim:xs].set(states.astype(jnp.float32))
    inp = inp.at[:batch, t_col].set(timesteps.astype(jnp.float32))

    kernel = functools.partial(diffusion_mlp_kernel, emb_scale=emb_scale, t_col=t_col)
    weights = [packed[k] for k in _WEIGHT_KEYS] + [packed["b_slab"]]

    # Explicit VMEM budget: resident (bf16) weight blocks + double-buffered
    # activation tiles + in-kernel f32 live values, with headroom.  Never below
    # the 32 MiB default scoped limit, capped under v7x's 64 MiB physical VMEM.
    weight_bytes = sum(int(w.size) * w.dtype.itemsize for w in weights)
    act_bytes = 2 * 2 * tb * max(in_cols, out_cols) * 4
    live_bytes = 8 * tb * max(hpad, t2pad) * 4
    need = 2 * weight_bytes + act_bytes + live_bytes + (4 << 20)
    vmem_limit = int(min(max(need, 32 << 20), 60 << 20))
    # TODO(synk): for hidden_dim >= ~4096 the bf16 w1/w2 blocks alone blow this
    # budget; add a hidden-dim tiling grid axis instead of keeping them resident.

    def run(single_buffer_weights):
        def w_spec(a):
            if single_buffer_weights:
                # Grid-invariant slabs need only one VMEM buffer.
                return pl.BlockSpec(a.shape, lambda i: (0, 0),
                                    pipeline_mode=pl.Buffered(1))
            return pl.BlockSpec(a.shape, lambda i: (0, 0))

        return pl.pallas_call(
            kernel,
            out_shape=jax.ShapeDtypeStruct((b_pad, out_cols), jnp.float32),
            grid=(b_pad // tb,),
            in_specs=[pl.BlockSpec((tb, in_cols), lambda i: (i, 0))]
                     + [w_spec(w) for w in weights],
            out_specs=pl.BlockSpec((tb, out_cols), lambda i: (i, 0)),
            compiler_params=pltpu.CompilerParams(
                dimension_semantics=("parallel",),
                vmem_limit_bytes=vmem_limit),
        )(inp, *weights)

    try:
        out_pad = run(True)
    except Exception:
        # pl.Buffered(1) not supported by this jax/libtpu combo: default buffering.
        out_pad = run(False)

    return out_pad[:batch, :action_dim]


# -----------------------------------------------------------------------------
# Synthetic params + pure-JAX reference
# -----------------------------------------------------------------------------
def init_params(key, state_dim, action_dim, hidden_dim, time_emb_dim, num_layers=4):
    """Deterministic synthetic parameters. Weights stored [in, out]."""
    keys = jax.random.split(key, 2 + num_layers)

    def linear(k, fan_in, fan_out):
        kw, kb = jax.random.split(k)
        bound = 1.0 / math.sqrt(fan_in)
        w = jax.random.uniform(kw, (fan_in, fan_out), jnp.float32, -bound, bound)
        b = jax.random.uniform(kb, (1, fan_out), jnp.float32, -bound, bound)
        return w, b

    p = {}
    p["wt1"], p["bt1"] = linear(keys[0], time_emb_dim, time_emb_dim * 2)
    p["wt2"], p["bt2"] = linear(keys[1], time_emb_dim * 2, time_emb_dim)

    in_dim = action_dim + state_dim + time_emb_dim
    for i in range(num_layers):
        out_dim = hidden_dim if i < num_layers - 1 else action_dim
        p[f"w{i}"], p[f"b{i}"] = linear(keys[2 + i], in_dim, out_dim)
        in_dim = hidden_dim
    return p


def reference_forward(x, timesteps, states, params, *, time_emb_dim):
    """Pure-JAX f32 reference (mirrors the PyTorch module in eval mode)."""
    half_dim = time_emb_dim // 2
    emb_scale = math.log(10000.0) / max(half_dim - 1, 1)
    freqs = jnp.exp(jnp.arange(half_dim, dtype=jnp.float32) * -emb_scale)
    arg = timesteps.astype(jnp.float32)[:, None] * freqs[None, :]
    pos = jnp.concatenate([jnp.sin(arg), jnp.cos(arg)], axis=-1)

    h_t = _silu(pos @ params["wt1"] + params["bt1"])
    t_emb = h_t @ params["wt2"] + params["bt2"]

    h = jnp.concatenate([x, states, t_emb], axis=-1)
    h = _silu(h @ params["w0"] + params["b0"])
    h = _silu(h @ params["w1"] + params["b1"])
    h = _silu(h @ params["w2"] + params["b2"])
    return h @ params["w3"] + params["b3"]


if __name__ == "__main__":
    # Small shapes consistent with the module's forward signature.
    batch = 8
    state_dim = 16
    action_dim = 8
    hidden_dim = 32
    time_emb_dim = 16
    num_layers = 4

    key = jax.random.PRNGKey(0)
    k_p, k_x, k_s, k_t = jax.random.split(key, 4)

    params = init_params(k_p, state_dim, action_dim, hidden_dim, time_emb_dim, num_layers)
    packed = pack_params(params, state_dim=state_dim, action_dim=action_dim,
                         hidden_dim=hidden_dim, time_emb_dim=time_emb_dim)

    x = jax.random.normal(k_x, (batch, action_dim), jnp.float32)
    states = jax.random.normal(k_s, (batch, state_dim), jnp.float32)
    timesteps = jax.random.randint(k_t, (batch,), 0, 1000).astype(jnp.float32)

    out = diffusion_mlp_forward(x, timesteps, states, packed,
                                state_dim=state_dim, action_dim=action_dim,
                                time_emb_dim=time_emb_dim)
    out = jax.block_until_ready(out)

    ref = reference_forward(x, timesteps, states, params, time_emb_dim=time_emb_dim)
    assert out.shape == (batch, action_dim)
    # bf16 weights / bf16 matmul operands with f32 accumulation -> relaxed tol.
    assert jnp.allclose(out, ref, atol=6e-2, rtol=6e-2), "mismatch vs reference"

    print("KERNEL_OK")
</pallas_src>

<mosaic_0001>
module attributes {stable_mosaic.version = 11 : i64} {
  func.func @diffusion_mlp_kernel(%arg0: i32, %arg1: memref<8x128xf32, #tpu.memory_space<vmem>>, %arg2: memref<128x128xbf16, #tpu.memory_space<vmem>>, %arg3: memref<128x128xbf16, #tpu.memory_space<vmem>>, %arg4: memref<128x128xbf16, #tpu.memory_space<vmem>>, %arg5: memref<128x128xbf16, #tpu.memory_space<vmem>>, %arg6: memref<128x128xbf16, #tpu.memory_space<vmem>>, %arg7: memref<128x128xbf16, #tpu.memory_space<vmem>>, %arg8: memref<128x128xbf16, #tpu.memory_space<vmem>>, %arg9: memref<128x128xbf16, #tpu.memory_space<vmem>>, %arg10: memref<8x128xf32, #tpu.memory_space<vmem>>, %arg11: memref<8x128xf32, #tpu.memory_space<vmem>>) attributes {dimension_semantics = [#tpu.dimension_semantics<parallel>], iteration_bounds = array<i64: 1>, scalar_prefetch = 0 : i64, scratch_operands = 0 : i64, tpu.core_type = #tpu.core_type<tc>, window_params = [{transform_indices = @transform_0, window_bounds = array<i64: 8, 128>}, {pipeline_mode = #tpu.pipeline_mode<synchronous>, transform_indices = @transform_1, window_bounds = array<i64: 128, 128>}, {pipeline_mode = #tpu.pipeline_mode<synchronous>, transform_indices = @transform_2, window_bounds = array<i64: 128, 128>}, {pipeline_mode = #tpu.pipeline_mode<synchronous>, transform_indices = @transform_3, window_bounds = array<i64: 128, 128>}, {pipeline_mode = #tpu.pipeline_mode<synchronous>, transform_indices = @transform_4, window_bounds = array<i64: 128, 128>}, {pipeline_mode = #tpu.pipeline_mode<synchronous>, transform_indices = @transform_5, window_bounds = array<i64: 128, 128>}, {pipeline_mode = #tpu.pipeline_mode<synchronous>, transform_indices = @transform_6, window_bounds = array<i64: 128, 128>}, {pipeline_mode = #tpu.pipeline_mode<synchronous>, transform_indices = @transform_7, window_bounds = array<i64: 128, 128>}, {pipeline_mode = #tpu.pipeline_mode<synchronous>, transform_indices = @transform_8, window_bounds = array<i64: 128, 128>}, {pipeline_mode = #tpu.pipeline_mode<synchronous>, transform_indices = @transform_9, window_bounds = array<i64: 8, 128>}, {transform_indices = @transform_10, window_bounds = array<i64: 8, 128>}]} {
    %c0 = arith.constant 0 : index
    %c0_0 = arith.constant 0 : index
    %0 = vector.load %arg1[%c0, %c0_0] : memref<8x128xf32, #tpu.memory_space<vmem>>, vector<8x128xf32>
    %c0_1 = arith.constant 0 : index
    %c0_2 = arith.constant 0 : index
    %1 = vector.load %arg10[%c0_1, %c0_2] : memref<8x128xf32, #tpu.memory_space<vmem>>, vector<8x128xf32>
    %2 = tpu.iota {dimensions = array<i32: 1>} : vector<1x128xi32>
    %3 = arith.sitofp %2 : vector<1x128xi32> to vector<1x128xf32>
    %cst = arith.constant -1.31576288 : f32
    %4 = vector.broadcast %cst : f32 to vector<1x128xf32>
    %5 = arith.mulf %3, %4 : vector<1x128xf32>
    %6 = math.exp %5 : vector<1x128xf32>
    %7 = vector.extract_strided_slice %0 {offsets = [0, 24], sizes = [8, 1], strides = [1, 1]} : vector<8x128xf32> to vector<8x1xf32>
    %8 = vector.broadcast %7 : vector<8x1xf32> to vector<8x128xf32>
    %9 = vector.broadcast %6 : vector<1x128xf32> to vector<8x128xf32>
    %10 = arith.mulf %8, %9 : vector<8x128xf32>
    %11 = math.sin %10 : vector<8x128xf32>
    %12 = arith.truncf %11 : vector<8x128xf32> to vector<8x128xbf16>
    %13 = math.cos %10 : vector<8x128xf32>
    %14 = arith.truncf %13 : vector<8x128xf32> to vector<8x128xbf16>
    %c0_3 = arith.constant 0 : index
    %c0_4 = arith.constant 0 : index
    %15 = vector.load %arg2[%c0_3, %c0_4] : memref<128x128xbf16, #tpu.memory_space<vmem>>, vector<128x128xbf16>
    %cst_5 = arith.constant dense<0.000000e+00> : vector<8x128xf32>
    %16 = tpu.matmul %12, %15, %cst_5 {dimension_numbers = #tpu.dot_dimension_numbers<[1], [0], [0], [1], [0, 0, 1, 1], [], []>} : vector<8x128xbf16>, vector<128x128xbf16>, vector<8x128xf32> -> vector<8x128xf32>
    %c0_6 = arith.constant 0 : index
    %c0_7 = arith.constant 0 : index
    %17 = vector.load %arg3[%c0_6, %c0_7] : memref<128x128xbf16, #tpu.memory_space<vmem>>, vector<128x128xbf16>
    %cst_8 = arith.constant dense<0.000000e+00> : vector<8x128xf32>
    %18 = tpu.matmul %14, %17, %cst_8 {dimension_numbers = #tpu.dot_dimension_numbers<[1], [0], [0], [1], [0, 0, 1, 1], [], []>} : vector<8x128xbf16>, vector<128x128xbf16>, vector<8x128xf32> -> vector<8x128xf32>
    %19 = arith.addf %16, %18 : vector<8x128xf32>
    %20 = vector.extract_strided_slice %1 {offsets = [0, 0], sizes = [1, 128], strides = [1, 1]} : vector<8x128xf32> to vector<1x128xf32>
    %21 = vector.broadcast %20 : vector<1x128xf32> to vector<8x128xf32>
    %22 = arith.addf %19, %21 : vector<8x128xf32>
    %23 = arith.negf %22 : vector<8x128xf32>
    %24 = math.exp %23 : vector<8x128xf32>
    %cst_9 = arith.constant 1.000000e+00 : f32
    %25 = vector.broadcast %cst_9 : f32 to vector<8x128xf32>
    %26 = arith.addf %25, %24 : vector<8x128xf32>
    %27 = arith.divf %25, %26 : vector<8x128xf32>
    %28 = arith.mulf %22, %27 : vector<8x128xf32>
    %29 = arith.truncf %28 : vector<8x128xf32> to vector<8x128xbf16>
    %c0_10 = arith.constant 0 : index
    %c0_11 = arith.constant 0 : index
    %30 = vector.load %arg4[%c0_10, %c0_11] : memref<128x128xbf16, #tpu.memory_space<vmem>>, vector<128x128xbf16>
    %cst_12 = arith.constant dense<0.000000e+00> : vector<8x128xf32>
    %31 = tpu.matmul %29, %30, %cst_12 {dimension_numbers = #tpu.dot_dimension_numbers<[1], [0], [0], [1], [0, 0, 1, 1], [], []>} : vector<8x128xbf16>, vector<128x128xbf16>, vector<8x128xf32> -> vector<8x128xf32>
    %32 = vector.extract_strided_slice %1 {offsets = [1, 0], sizes = [1, 128], strides = [1, 1]} : vector<8x128xf32> to vector<1x128xf32>
    %33 = vector.broadcast %32 : vector<1x128xf32> to vector<8x128xf32>
    %34 = arith.addf %31, %33 : vector<8x128xf32>
    %35 = arith.truncf %0 : vector<8x128xf32> to vector<8x128xbf16>
    %c0_13 = arith.constant 0 : index
    %c0_14 = arith.constant 0 : index
    %36 = vector.load %arg5[%c0_13, %c0_14] : memref<128x128xbf16, #tpu.memory_space<vmem>>, vector<128x128xbf16>
    %cst_15 = arith.constant dense<0.000000e+00> : vector<8x128xf32>
    %37 = tpu.matmul %35, %36, %cst_15 {dimension_numbers = #tpu.dot_dimension_numbers<[1], [0], [0], [1], [0, 0, 1, 1], [], []>} : vector<8x128xbf16>, vector<128x128xbf16>, vector<8x128xf32> -> vector<8x128xf32>
    %38 = arith.truncf %34 : vector<8x128xf32> to vector<8x128xbf16>
    %c0_16 = arith.constant 0 : index
    %c0_17 = arith.constant 0 : index
    %39 = vector.load %arg6[%c0_16, %c0_17] : memref<128x128xbf16, #tpu.memory_space<vmem>>, vector<128x128xbf16>
    %cst_18 = arith.constant dense<0.000000e+00> : vector<8x128xf32>
    %40 = tpu.matmul %38, %39, %cst_18 {dimension_numbers = #tpu.dot_dimension_numbers<[1], [0], [0], [1], [0, 0, 1, 1], [], []>} : vector<8x128xbf16>, vector<128x128xbf16>, vector<8x128xf32> -> vector<8x128xf32>
    %41 = arith.addf %37, %40 : vector<8x128xf32>
    %42 = vector.extract_strided_slice %1 {offsets = [2, 0], sizes = [1, 128], strides = [1, 1]} : vector<8x128xf32> to vector<1x128xf32>
    %43 = vector.broadcast %42 : vector<1x128xf32> to vector<8x128xf32>
    %44 = arith.addf %41, %43 : vector<8x128xf32>
    %45 = arith.negf %44 : vector<8x128xf32>
    %46 = math.exp %45 : vector<8x128xf32>
    %cst_19 = arith.constant 1.000000e+00 : f32
    %47 = vector.broadcast %cst_19 : f32 to vector<8x128xf32>
    %48 = arith.addf %47, %46 : vector<8x128xf32>
    %49 = arith.divf %47, %48 : vector<8x128xf32>
    %50 = arith.mulf %44, %49 : vector<8x128xf32>
    %51 = arith.truncf %50 : vector<8x128xf32> to vector<8x128xbf16>
    %c0_20 = arith.constant 0 : index
    %c0_21 = arith.constant 0 : index
    %52 = vector.load %arg7[%c0_20, %c0_21] : memref<128x128xbf16, #tpu.memory_space<vmem>>, vector<128x128xbf16>
    %cst_22 = arith.constant dense<0.000000e+00> : vector<8x128xf32>
    %53 = tpu.matmul %51, %52, %cst_22 {dimension_numbers = #tpu.dot_dimension_numbers<[1], [0], [0], [1], [0, 0, 1, 1], [], []>} : vector<8x128xbf16>, vector<128x128xbf16>, vector<8x128xf32> -> vector<8x128xf32>
    %54 = vector.extract_strided_slice %1 {offsets = [3, 0], sizes = [1, 128], strides = [1, 1]} : vector<8x128xf32> to vector<1x128xf32>
    %55 = vector.broadcast %54 : vector<1x128xf32> to vector<8x128xf32>
    %56 = arith.addf %53, %55 : vector<8x128xf32>
    %57 = arith.negf %56 : vector<8x128xf32>
    %58 = math.exp %57 : vector<8x128xf32>
    %cst_23 = arith.constant 1.000000e+00 : f32
    %59 = vector.broadcast %cst_23 : f32 to vector<8x128xf32>
    %60 = arith.addf %59, %58 : vector<8x128xf32>
    %61 = arith.divf %59, %60 : vector<8x128xf32>
    %62 = arith.mulf %56, %61 : vector<8x128xf32>
    %63 = arith.truncf %62 : vector<8x128xf32> to vector<8x128xbf16>
    %c0_24 = arith.constant 0 : index
    %c0_25 = arith.constant 0 : index
    %64 = vector.load %arg8[%c0_24, %c0_25] : memref<128x128xbf16, #tpu.memory_space<vmem>>, vector<128x128xbf16>
    %cst_26 = arith.constant dense<0.000000e+00> : vector<8x128xf32>
    %65 = tpu.matmul %63, %64, %cst_26 {dimension_numbers = #tpu.dot_dimension_numbers<[1], [0], [0], [1], [0, 0, 1, 1], [], []>} : vector<8x128xbf16>, vector<128x128xbf16>, vector<8x128xf32> -> vector<8x128xf32>
    %66 = vector.extract_strided_slice %1 {offsets = [4, 0], sizes = [1, 128], strides = [1, 1]} : vector<8x128xf32> to vector<1x128xf32>
    %67 = vector.broadcast %66 : vector<1x128xf32> to vector<8x128xf32>
    %68 = arith.addf %65, %67 : vector<8x128xf32>
    %69 = arith.negf %68 : vector<8x128xf32>
    %70 = math.exp %69 : vector<8x128xf32>
    %cst_27 = arith.constant 1.000000e+00 : f32
    %71 = vector.broadcast %cst_27 : f32 to vector<8x128xf32>
    %72 = arith.addf %71, %70 : vector<8x128xf32>
    %73 = arith.divf %71, %72 : vector<8x128xf32>
    %74 = arith.mulf %68, %73 : vector<8x128xf32>
    %75 = arith.truncf %74 : vector<8x128xf32> to vector<8x128xbf16>
    %c0_28 = arith.constant 0 : index
    %c0_29 = arith.constant 0 : index
    %76 = vector.load %arg9[%c0_28, %c0_29] : memref<128x128xbf16, #tpu.memory_space<vmem>>, vector<128x128xbf16>
    %cst_30 = arith.constant dense<0.000000e+00> : vector<8x128xf32>
    %77 = tpu.matmul %75, %76, %cst_30 {dimension_numbers = #tpu.dot_dimension_numbers<[1], [0], [0], [1], [0, 0, 1, 1], [], []>} : vector<8x128xbf16>, vector<128x128xbf16>, vector<8x128xf32> -> vector<8x128xf32>
    %78 = vector.extract_strided_slice %1 {offsets = [5, 0], sizes = [1, 128], strides = [1, 1]} : vector<8x128xf32> to vector<1x128xf32>
    %79 = vector.broadcast %78 : vector<1x128xf32> to vector<8x128xf32>
    %80 = arith.addf %77, %79 : vector<8x128xf32>
    %c0_31 = arith.constant 0 : index
    %c0_32 = arith.constant 0 : index
    %81 = vector.load %arg11[%c0_31, %c0_32] : memref<8x128xf32, #tpu.memory_space<vmem>>, vector<8x128xf32>
    tpu.vector_store %arg11[%c0_31, %c0_32], %80 {strides = array<i32>} : memref<8x128xf32, #tpu.memory_space<vmem>>, vector<8x128xf32>,
    return
  }
  func.func @transform_0(%arg0: i32) -> (i32, i32) {
    %c0_i32 = arith.constant 0 : i32
    %c0_i32_0 = arith.constant 0 : i32
    return %arg0, %c0_i32 : i32, i32
  }
  func.func @transform_1(%arg0: i32) -> (i32, i32) {
    %c0_i32 = arith.constant 0 : i32
    %c0_i32_0 = arith.constant 0 : i32
    %c0_i32_1 = arith.constant 0 : i32
    return %c0_i32, %c0_i32_0 : i32, i32
  }
  func.func @transform_2(%arg0: i32) -> (i32, i32) {
    %c0_i32 = arith.constant 0 : i32
    %c0_i32_0 = arith.constant 0 : i32
    %c0_i32_1 = arith.constant 0 : i32
    return %c0_i32, %c0_i32_0 : i32, i32
  }
  func.func @transform_3(%arg0: i32) -> (i32, i32) {
    %c0_i32 = arith.constant 0 : i32
    %c0_i32_0 = arith.constant 0 : i32
    %c0_i32_1 = arith.constant 0 : i32
    return %c0_i32, %c0_i32_0 : i32, i32
  }
  func.func @transform_4(%arg0: i32) -> (i32, i32) {
    %c0_i32 = arith.constant 0 : i32
    %c0_i32_0 = arith.constant 0 : i32
    %c0_i32_1 = arith.constant 0 : i32
    return %c0_i32, %c0_i32_0 : i32, i32
  }
  func.func @transform_5(%arg0: i32) -> (i32, i32) {
    %c0_i32 = arith.constant 0 : i32
    %c0_i32_0 = arith.constant 0 : i32
    %c0_i32_1 = arith.constant 0 : i32
    return %c0_i32, %c0_i32_0 : i32, i32
  }
  func.func @transform_6(%arg0: i32) -> (i32, i32) {
    %c0_i32 = arith.constant 0 : i32
    %c0_i32_0 = arith.constant 0 : i32
    %c0_i32_1 = arith.constant 0 : i32
    return %c0_i32, %c0_i32_0 : i32, i32
  }
  func.func @transform_7(%arg0: i32) -> (i32, i32) {
    %c0_i32 = arith.constant 0 : i32
    %c0_i32_0 = arith.constant 0 : i32
    %c0_i32_1 = arith.constant 0 : i32
    return %c0_i32, %c0_i32_0 : i32, i32
  }
  func.func @transform_8(%arg0: i32) -> (i32, i32) {
    %c0_i32 = arith.constant 0 : i32
    %c0_i32_0 = arith.constant 0 : i32
    %c0_i32_1 = arith.constant 0 : i32
    return %c0_i32, %c0_i32_0 : i32, i32
  }
  func.func @transform_9(%arg0: i32) -> (i32, i32) {
    %c0_i32 = arith.constant 0 : i32
    %c0_i32_0 = arith.constant 0 : i32
    %c0_i32_1 = arith.constant 0 : i32
    return %c0_i32, %c0_i32_0 : i32, i32
  }
  func.func @transform_10(%arg0: i32) -> (i32, i32) {
    %c0_i32 = arith.constant 0 : i32
    %c0_i32_0 = arith.constant 0 : i32
    return %arg0, %c0_i32 : i32, i32
  }
}

module attributes {stable_mosaic.version = 11 : i64} {
  func.func @diffusion_mlp_kernel(%arg0: i32, %arg1: memref<8x128xf32, #tpu.memory_space<vmem>>, %arg2: memref<128x128xbf16, #tpu.memory_space<vmem>>, %arg3: memref<128x128xbf16, #tpu.memory_space<vmem>>, %arg4: memref<128x128xbf16, #tpu.memory_space<vmem>>, %arg5: memref<128x128xbf16, #tpu.memory_space<vmem>>, %arg6: memref<128x128xbf16, #tpu.memory_space<vmem>>, %arg7: memref<128x128xbf16, #tpu.memory_space<vmem>>, %arg8: memref<128x128xbf16, #tpu.memory_space<vmem>>, %arg9: memref<128x128xbf16, #tpu.memory_space<vmem>>, %arg10: memref<8x128xf32, #tpu.memory_space<vmem>>, %arg11: memref<8x128xf32, #tpu.memory_space<vmem>>) attributes {dimension_semantics = [#tpu.dimension_semantics<parallel>], iteration_bounds = array<i64: 1>, scalar_prefetch = 0 : i64, scratch_operands = 0 : i64, tpu.core_type = #tpu.core_type<tc>, window_params = [{transform_indices = @transform_0, window_bounds = array<i64: 8, 128>}, {pipeline_mode = #tpu.pipeline_mode<synchronous>, transform_indices = @transform_1, window_bounds = array<i64: 128, 128>}, {pipeline_mode = #tpu.pipeline_mode<synchronous>, transform_indices = @transform_2, window_bounds = array<i64: 128, 128>}, {pipeline_mode = #tpu.pipeline_mode<synchronous>, transform_indices = @transform_3, window_bounds = array<i64: 128, 128>}, {pipeline_mode = #tpu.pipeline_mode<synchronous>, transform_indices = @transform_4, window_bounds = array<i64: 128, 128>}, {pipeline_mode = #tpu.pipeline_mode<synchronous>, transform_indices = @transform_5, window_bounds = array<i64: 128, 128>}, {pipeline_mode = #tpu.pipeline_mode<synchronous>, transform_indices = @transform_6, window_bounds = array<i64: 128, 128>}, {pipeline_mode = #tpu.pipeline_mode<synchronous>, transform_indices = @transform_7, window_bounds = array<i64: 128, 128>}, {pipeline_mode = #tpu.pipeline_mode<synchronous>, transform_indices = @transform_8, window_bounds = array<i64: 128, 128>}, {pipeline_mode = #tpu.pipeline_mode<synchronous>, transform_indices = @transform_9, window_bounds = array<i64: 8, 128>}, {transform_indices = @transform_10, window_bounds = array<i64: 8, 128>}]} {
    %c0 = arith.constant 0 : index
    %c0_0 = arith.constant 0 : index
    %0 = vector.load %arg1[%c0, %c0_0] : memref<8x128xf32, #tpu.memory_space<vmem>>, vector<8x128xf32>
    %c0_1 = arith.constant 0 : index
    %c0_2 = arith.constant 0 : index
    %1 = vector.load %arg10[%c0_1, %c0_2] : memref<8x128xf32, #tpu.memory_space<vmem>>, vector<8x128xf32>
    %2 = tpu.iota {dimensions = array<i32: 1>} : vector<1x128xi32>
    %3 = arith.sitofp %2 : vector<1x128xi32> to vector<1x128xf32>
    %cst = arith.constant -1.31576288 : f32
    %4 = vector.broadcast %cst : f32 to vector<1x128xf32>
    %5 = arith.mulf %3, %4 : vector<1x128xf32>
    %6 = math.exp %5 : vector<1x128xf32>
    %7 = vector.extract_strided_slice %0 {offsets = [0, 24], sizes = [8, 1], strides = [1, 1]} : vector<8x128xf32> to vector<8x1xf32>
    %8 = vector.broadcast %7 : vector<8x1xf32> to vector<8x128xf32>
    %9 = vector.broadcast %6 : vector<1x128xf32> to vector<8x128xf32>
    %10 = arith.mulf %8, %9 : vector<8x128xf32>
    %11 = math.sin %10 : vector<8x128xf32>
    %12 = arith.truncf %11 : vector<8x128xf32> to vector<8x128xbf16>
    %13 = math.cos %10 : vector<8x128xf32>
    %14 = arith.truncf %13 : vector<8x128xf32> to vector<8x128xbf16>
    %c0_3 = arith.constant 0 : index
    %c0_4 = arith.constant 0 : index
    %15 = vector.load %arg2[%c0_3, %c0_4] : memref<128x128xbf16, #tpu.memory_space<vmem>>, vector<128x128xbf16>
    %cst_5 = arith.constant dense<0.000000e+00> : vector<8x128xf32>
    %16 = tpu.matmul %12, %15, %cst_5 {dimension_numbers = #tpu.dot_dimension_numbers<[1], [0], [0], [1], [0, 0, 1, 1], [], []>} : vector<8x128xbf16>, vector<128x128xbf16>, vector<8x128xf32> -> vector<8x128xf32>
    %c0_6 = arith.constant 0 : index
    %c0_7 = arith.constant 0 : index
    %17 = vector.load %arg3[%c0_6, %c0_7] : memref<128x128xbf16, #tpu.memory_space<vmem>>, vector<128x128xbf16>
    %cst_8 = arith.constant dense<0.000000e+00> : vector<8x128xf32>
    %18 = tpu.matmul %14, %17, %cst_8 {dimension_numbers = #tpu.dot_dimension_numbers<[1], [0], [0], [1], [0, 0, 1, 1], [], []>} : vector<8x128xbf16>, vector<128x128xbf16>, vector<8x128xf32> -> vector<8x128xf32>
    %19 = arith.addf %16, %18 : vector<8x128xf32>
    %20 = vector.extract_strided_slice %1 {offsets = [0, 0], sizes = [1, 128], strides = [1, 1]} : vector<8x128xf32> to vector<1x128xf32>
    %21 = vector.broadcast %20 : vector<1x128xf32> to vector<8x128xf32>
    %22 = arith.addf %19, %21 : vector<8x128xf32>
    %23 = arith.negf %22 : vector<8x128xf32>
    %24 = math.exp %23 : vector<8x128xf32>
    %cst_9 = arith.constant 1.000000e+00 : f32
    %25 = vector.broadcast %cst_9 : f32 to vector<8x128xf32>
    %26 = arith.addf %25, %24 : vector<8x128xf32>
    %27 = arith.divf %25, %26 : vector<8x128xf32>
    %28 = arith.mulf %22, %27 : vector<8x128xf32>
    %29 = arith.truncf %28 : vector<8x128xf32> to vector<8x128xbf16>
    %c0_10 = arith.constant 0 : index
    %c0_11 = arith.constant 0 : index
    %30 = vector.load %arg4[%c0_10, %c0_11] : memref<128x128xbf16, #tpu.memory_space<vmem>>, vector<128x128xbf16>
    %cst_12 = arith.constant dense<0.000000e+00> : vector<8x128xf32>
    %31 = tpu.matmul %29, %30, %cst_12 {dimension_numbers = #tpu.dot_dimension_numbers<[1], [0], [0], [1], [0, 0, 1, 1], [], []>} : vector<8x128xbf16>, vector<128x128xbf16>, vector<8x128xf32> -> vector<8x128xf32>
    %32 = vector.extract_strided_slice %1 {offsets = [1, 0], sizes = [1, 128], strides = [1, 1]} : vector<8x128xf32> to vector<1x128xf32>
    %33 = vector.broadcast %32 : vector<1x128xf32> to vector<8x128xf32>
    %34 = arith.addf %31, %33 : vector<8x128xf32>
    %35 = arith.truncf %0 : vector<8x128xf32> to vector<8x128xbf16>
    %c0_13 = arith.constant 0 : index
    %c0_14 = arith.constant 0 : index
    %36 = vector.load %arg5[%c0_13, %c0_14] : memref<128x128xbf16, #tpu.memory_space<vmem>>, vector<128x128xbf16>
    %cst_15 = arith.constant dense<0.000000e+00> : vector<8x128xf32>
    %37 = tpu.matmul %35, %36, %cst_15 {dimension_numbers = #tpu.dot_dimension_numbers<[1], [0], [0], [1], [0, 0, 1, 1], [], []>} : vector<8x128xbf16>, vector<128x128xbf16>, vector<8x128xf32> -> vector<8x128xf32>
    %38 = arith.truncf %34 : vector<8x128xf32> to vector<8x128xbf16>
    %c0_16 = arith.constant 0 : index
    %c0_17 = arith.constant 0 : index
    %39 = vector.load %arg6[%c0_16, %c0_17] : memref<128x128xbf16, #tpu.memory_space<vmem>>, vector<128x128xbf16>
    %cst_18 = arith.constant dense<0.000000e+00> : vector<8x128xf32>
    %40 = tpu.matmul %38, %39, %cst_18 {dimension_numbers = #tpu.dot_dimension_numbers<[1], [0], [0], [1], [0, 0, 1, 1], [], []>} : vector<8x128xbf16>, vector<128x128xbf16>, vector<8x128xf32> -> vector<8x128xf32>
    %41 = arith.addf %37, %40 : vector<8x128xf32>
    %42 = vector.extract_strided_slice %1 {offsets = [2, 0], sizes = [1, 128], strides = [1, 1]} : vector<8x128xf32> to vector<1x128xf32>
    %43 = vector.broadcast %42 : vector<1x128xf32> to vector<8x128xf32>
    %44 = arith.addf %41, %43 : vector<8x128xf32>
    %45 = arith.negf %44 : vector<8x128xf32>
    %46 = math.exp %45 : vector<8x128xf32>
    %cst_19 = arith.constant 1.000000e+00 : f32
    %47 = vector.broadcast %cst_19 : f32 to vector<8x128xf32>
    %48 = arith.addf %47, %46 : vector<8x128xf32>
    %49 = arith.divf %47, %48 : vector<8x128xf32>
    %50 = arith.mulf %44, %49 : vector<8x128xf32>
    %51 = arith.truncf %50 : vector<8x128xf32> to vector<8x128xbf16>
    %c0_20 = arith.constant 0 : index
    %c0_21 = arith.constant 0 : index
    %52 = vector.load %arg7[%c0_20, %c0_21] : memref<128x128xbf16, #tpu.memory_space<vmem>>, vector<128x128xbf16>
    %cst_22 = arith.constant dense<0.000000e+00> : vector<8x128xf32>
    %53 = tpu.matmul %51, %52, %cst_22 {dimension_numbers = #tpu.dot_dimension_numbers<[1], [0], [0], [1], [0, 0, 1, 1], [], []>} : vector<8x128xbf16>, vector<128x128xbf16>, vector<8x128xf32> -> vector<8x128xf32>
    %54 = vector.extract_strided_slice %1 {offsets = [3, 0], sizes = [1, 128], strides = [1, 1]} : vector<8x128xf32> to vector<1x128xf32>
    %55 = vector.broadcast %54 : vector<1x128xf32> to vector<8x128xf32>
    %56 = arith.addf %53, %55 : vector<8x128xf32>
    %57 = arith.negf %56 : vector<8x128xf32>
    %58 = math.exp %57 : vector<8x128xf32>
    %cst_23 = arith.constant 1.000000e+00 : f32
    %59 = vector.broadcast %cst_23 : f32 to vector<8x128xf32>
    %60 = arith.addf %59, %58 : vector<8x128xf32>
    %61 = arith.divf %59, %60 : vector<8x128xf32>
    %62 = arith.mulf %56, %61 : vector<8x128xf32>
    %63 = arith.truncf %62 : vector<8x128xf32> to vector<8x128xbf16>
    %c0_24 = arith.constant 0 : index
    %c0_25 = arith.constant 0 : index
    %64 = vector.load %arg8[%c0_24, %c0_25] : memref<128x128xbf16, #tpu.memory_space<vmem>>, vector<128x128xbf16>
    %cst_26 = arith.constant dense<0.000000e+00> : vector<8x128xf32>
    %65 = tpu.matmul %63, %64, %cst_26 {dimension_numbers = #tpu.dot_dimension_numbers<[1], [0], [0], [1], [0, 0, 1, 1], [], []>} : vector<8x128xbf16>, vector<128x128xbf16>, vector<8x128xf32> -> vector<8x128xf32>
    %66 = vector.extract_strided_slice %1 {offsets = [4, 0], sizes = [1, 128], strides = [1, 1]} : vector<8x128xf32> to vector<1x128xf32>
    %67 = vector.broadcast %66 : vector<1x128xf32> to vector<8x128xf32>
    %68 = arith.addf %65, %67 : vector<8x128xf32>
    %69 = arith.negf %68 : vector<8x128xf32>
    %70 = math.exp %69 : vector<8x128xf32>
    %cst_27 = arith.constant 1.000000e+00 : f32
    %71 = vector.broadcast %cst_27 : f32 to vector<8x128xf32>
    %72 = arith.addf %71, %70 : vector<8x128xf32>
    %73 = arith.divf %71, %72 : vector<8x128xf32>
    %74 = arith.mulf %68, %73 : vector<8x128xf32>
    %75 = arith.truncf %74 : vector<8x128xf32> to vector<8x128xbf16>
    %c0_28 = arith.constant 0 : index
    %c0_29 = arith.constant 0 : index
    %76 = vector.load %arg9[%c0_28, %c0_29] : memref<128x128xbf16, #tpu.memory_space<vmem>>, vector<128x128xbf16>
    %cst_30 = arith.constant dense<0.000000e+00> : vector<8x128xf32>
    %77 = tpu.matmul %75, %76, %cst_30 {dimension_numbers = #tpu.dot_dimension_numbers<[1], [0], [0], [1], [0, 0, 1, 1], [], []>} : vector<8x128xbf16>, vector<128x128xbf16>, vector<8x128xf32> -> vector<8x128xf32>
    %78 = vector.extract_strided_slice %1 {offsets = [5, 0], sizes = [1, 128], strides = [1, 1]} : vector<8x128xf32> to vector<1x128xf32>
    %79 = vector.broadcast %78 : vector<1x128xf32> to vector<8x128xf32>
    %80 = arith.addf %77, %79 : vector<8x128xf32>
    %c0_31 = arith.constant 0 : index
    %c0_32 = arith.constant 0 : index
    %81 = vector.load %arg11[%c0_31, %c0_32] : memref<8x128xf32, #tpu.memory_space<vmem>>, vector<8x128xf32>
    tpu.vector_store %arg11[%c0_31, %c0_32], %80 {strides = array<i32>} : memref<8x128xf32, #tpu.memory_space<vmem>>, vector<8x128xf32>,
    return
  }
  func.func @transform_0(%arg0: i32) -> (i32, i32) {
    %c0_i32 = arith.constant 0 : i32
    %c0_i32_0 = arith.constant 0 : i32
    return %arg0, %c0_i32 : i32, i32
  }
  func.func @transform_1(%arg0: i32) -> (i32, i32) {
    %c0_i32 = arith.constant 0 : i32
    %c0_i32_0 = arith.constant 0 : i32
    %c0_i32_1 = arith.constant 0 : i32
    return %c0_i32, %c0_i32_0 : i32, i32
  }
  func.func @transform_2(%arg0: i32) -> (i32, i32) {
    %c0_i32 = arith.constant 0 : i32
    %c0_i32_0 = arith.constant 0 : i32
    %c0_i32_1 = arith.constant 0 : i32
    return %c0_i32, %c0_i32_0 : i32, i32
  }
  func.func @transform_3(%arg0: i32) -> (i32, i32) {
    %c0_i32 = arith.constant 0 : i32
    %c0_i32_0 = arith.constant 0 : i32
    %c0_i32_1 = arith.constant 0 : i32
    return %c0_i32, %c0_i32_0 : i32, i32
  }
  func.func @transform_4(%arg0: i32) -> (i32, i32) {
    %c0_i32 = arith.constant 0 : i32
    %c0_i32_0 = arith.constant 0 : i32
    %c0_i32_1 = arith.constant 0 : i32
    return %c0_i32, %c0_i32_0 : i32, i32
  }
  func.func @transform_5(%arg0: i32) -> (i32, i32) {
    %c0_i32 = arith.constant 0 : i32
    %c0_i32_0 = arith.constant 0 : i32
    %c0_i32_1 = arith.constant 0 : i32
    return %c0_i32, %c0_i32_0 : i32, i32
  }
  func.func @transform_6(%arg0: i32) -> (i32, i32) {
    %c0_i32 = arith.constant 0 : i32
    %c0_i32_0 = arith.constant 0 : i32
    %c0_i32_1 = arith.constant 0 : i32
    return %c0_i32, %c0_i32_0 : i32, i32
  }
  func.func @transform_7(%arg0: i32) -> (i32, i32) {
    %c0_i32 = arith.constant 0 : i32
    %c0_i32_0 = arith.constant 0 : i32
    %c0_i32_1 = arith.constant 0 : i32
    return %c0_i32, %c0_i32_0 : i32, i32
  }
  func.func @transform_8(%arg0: i32) -> (i32, i32) {
    %c0_i32 = arith.constant 0 : i32
    %c0_i32_0 = arith.constant 0 : i32
    %c0_i32_1 = arith.constant 0 : i32
    return %c0_i32, %c0_i32_0 : i32, i32
  }
  func.func @transform_9(%arg0: i32) -> (i32, i32) {
    %c0_i32 = arith.constant 0 : i32
    %c0_i32_0 = arith.constant 0 : i32
    %c0_i32_1 = arith.constant 0 : i32
    return %c0_i32, %c0_i32_0 : i32, i32
  }
  func.func @transform_10(%arg0: i32) -> (i32, i32) {
    %c0_i32 = arith.constant 0 : i32
    %c0_i32_0 = arith.constant 0 : i32
    return %arg0, %c0_i32 : i32, i32
  }
}

</mosaic_0001>

<bundles_post_ra>
// kernel: tpu_custom_call.1
= control target key start
LH: loop header
LB: loop body
LE: loop exit
PB: predicated region body
PF: predicated region fallthrough
CT: control target
= control target key end

     0   :  { %15 = vsyncpa [#allocation3], 0  ;;  %s2291_s0 = inlined_call_operand.hbm [shape: f32[8,128], index: 0, kind: input, shape index: {}]   ;;  %s2292_s1 = inlined_call_operand.hbm [shape: bf16[128,128], index: 1, kind: input, shape index: {}]   ;;  %s2293_s2 = inlined_call_operand.hbm [shape: bf16[128,128], index: 2, kind: input, shape index: {}]   ;;  %s2294_s3 = inlined_call_operand.hbm [shape: bf16[128,128], index: 3, kind: input, shape index: {}]   ;;  %s2295_s4 = inlined_call_operand.hbm [shape: bf16[128,128], index: 4, kind: input, shape index: {}]   ;;  %s2296_s5 = inlined_call_operand.hbm [shape: bf16[128,128], index: 5, kind: input, shape index: {}]   ;;  %s2297_s6 = inlined_call_operand.hbm [shape: bf16[128,128], index: 6, kind: input, shape index: {}]   ;;  %s2298_s7 = inlined_call_operand.hbm [shape: bf16[128,128], index: 7, kind: input, shape index: {}]   ;;  %s2299_s8 = inlined_call_operand.hbm [shape: bf16[128,128], index: 8, kind: input, shape index: {}]   ;;  %s2300_s9 = inlined_call_operand.vmem [shape: f32[8,128], index: 9, kind: input, shape index: {}]   ;;  %s2301_s10 = inlined_call_operand.hbm [shape: f32[8,128], index: 10, kind: output, shape index: {}]  }
   0x1   :  { %16 = vsyncpa [#allocation6], 0 }
   0x2   :  { %17 = vsyncpa [#allocation9], 0 }
   0x3   :  { %18 = vsyncpa [#allocation12], 0 }
   0x4   :  { %19 = vsyncpa [#allocation15], 0 }
   0x5   :  { %20 = vsyncpa [#allocation4], 0  ;;  %s1944_s13 = smov [#allocation5]   ;;  %s1712_s17 = scalar_lea.hbm %s2292_s1, 1024 }
   0x6   :  { %s36_s14 = sshll.u32 %s1944_s13, 4  ;;  %p1713_p0 = scmp.ne.s32.totalorder %s2292_s1, %s1712_s17  ;;  %s37_s14 = int_to_ptr.vmem [resolvable:$true] %s36_s14 }
   0x7   :  { %p1716_p1 = scmp.lt.u32.totalorder %s1712_s17, %s2292_s1 }
   0x9   :  { %p1718_p2 = pnand %p1716_p1, %p1713_p0 }
   0xb   :  { %1721 = shalt.err (!%p1718_p2)
}
   0xc   :  { %s1722_s22 = scalar_lea.vmem %s37_s14, 1024  ;;  %p1727_p4 = scmp.lt.s32.totalorder %s37_s14, %s37_s14 }
   0xd   :  { %p1723_p3 = scmp.ne.s32.totalorder %s37_s14, %s1722_s22  ;;  %p1728_p5 = scmp.lt.s32.totalorder %s1722_s22, %s1722_s22 }
   0xf   :  { %p1729_p6 = por %p1728_p5, %p1727_p4 }
  0x11   :  { %p1730_p7 = pnand %p1729_p6, %p1723_p3 }
  0x13   :  { %1733 = shalt.err (!%p1730_p7)
}
  0x14   :  { %s1945_s23 = smov 64   ;;  %s1946_s24 = smov 4  }
  0x15   :  { %42 = dma.hbm_to_vmem [thread:$0]  %s2292_s1, 1024, %s37_s14, [#allocation6], %s1945_s23, %s1945_s23, %s1946_s24  }
  0x16   :  { %s1947_s27 = smov [#allocation8]   ;;  %s1948_s29 = smov [#allocation11]  }
  0x17   :  { %s60_s28 = sshll.u32 %s1947_s27, 4  ;;  %s84_s30 = sshll.u32 %s1948_s29, 4  ;;  %s61_s28 = int_to_ptr.vmem [resolvable:$true] %s60_s28  ;;  %s85_s30 = int_to_ptr.vmem [resolvable:$true] %s84_s30 }
  0x18   :  { %s1734_s13 = scalar_lea.hbm %s2294_s3, 1024 }
  0x19   :  { %p1735_p8 = scmp.ne.s32.totalorder %s2294_s3, %s1734_s13  ;;  %p1738_p9 = scmp.lt.u32.totalorder %s1734_s13, %s2294_s3 }
  0x1b   :  { %p1740_p10 = pnand %p1738_p9, %p1735_p8 }
  0x1d   :  { %1743 = shalt.err (!%p1740_p10)
}
  0x1e   :  { %s1744_s1 = scalar_lea.vmem %s61_s28, 1024  ;;  %p1749_p12 = scmp.lt.s32.totalorder %s61_s28, %s61_s28 }
  0x1f   :  { %p1745_p11 = scmp.ne.s32.totalorder %s61_s28, %s1744_s1  ;;  %p1750_p13 = scmp.lt.s32.totalorder %s1744_s1, %s1744_s1 }
  0x21   :  { %p1751_p0 = por %p1750_p13, %p1749_p12 }
  0x23   :  { %p1752_p1 = pnand %p1751_p0, %p1745_p11 }
  0x25   :  { %1755 = shalt.err (!%p1752_p1)
}
  0x26   :  { %66 = dma.hbm_to_vmem [thread:$0]  %s2294_s3, 1024, %s61_s28, [#allocation9], %s1945_s23, %s1945_s23, %s1946_s24  }
  0x27   :  { %s1756_s22 = scalar_lea.hbm %s2296_s5, 1024 }
  0x28   :  { %p1757_p2 = scmp.ne.s32.totalorder %s2296_s5, %s1756_s22  ;;  %p1760_p3 = scmp.lt.u32.totalorder %s1756_s22, %s2296_s5 }
  0x2a   :  { %p1762_p4 = pnand %p1760_p3, %p1757_p2 }
  0x2c   :  { %1765 = shalt.err (!%p1762_p4)
}
  0x2d   :  { %s1766_s11 = scalar_lea.vmem %s85_s30, 1024  ;;  %p1771_p6 = scmp.lt.s32.totalorder %s85_s30, %s85_s30 }
  0x2e   :  { %p1767_p5 = scmp.ne.s32.totalorder %s85_s30, %s1766_s11  ;;  %p1772_p7 = scmp.lt.s32.totalorder %s1766_s11, %s1766_s11 }
  0x30   :  { %p1773_p8 = por %p1772_p7, %p1771_p6 }
  0x32   :  { %p1774_p9 = pnand %p1773_p8, %p1767_p5 }
  0x34   :  { %1777 = shalt.err (!%p1774_p9)
}
  0x35   :  { %90 = dma.hbm_to_vmem [thread:$0]  %s2296_s5, 1024, %s85_s30, [#allocation12], %s1945_s23, %s1945_s23, %s1946_s24  }
  0x36   :  { %s1949_s12 = smov [#allocation14]   ;;  %s1950_s15 = smov [#allocation2]  }
  0x37   :  { %s108_s13 = sshll.u32 %s1949_s12, 4  ;;  %s27_s16 = sshll.u32 %s1950_s15, 4  ;;  %s109_s13 = int_to_ptr.vmem [resolvable:$true] %s108_s13  ;;  %s28_s16 = int_to_ptr.vmem [resolvable:$true] %s27_s16 }
  0x38   :  { %s1778_s1 = scalar_lea.hbm %s2298_s7, 1024 }
  0x39   :  { %p1779_p10 = scmp.ne.s32.totalorder %s2298_s7, %s1778_s1  ;;  %p1782_p11 = scmp.lt.u32.totalorder %s1778_s1, %s2298_s7 }
  0x3b   :  { %p1784_p12 = pnand %p1782_p11, %p1779_p10 }
  0x3d   :  { %1787 = shalt.err (!%p1784_p12)
}
  0x3e   :  { %s1788_s5 = scalar_lea.vmem %s109_s13, 1024  ;;  %p1793_p0 = scmp.lt.s32.totalorder %s109_s13, %s109_s13 }
  0x3f   :  { %p1789_p13 = scmp.ne.s32.totalorder %s109_s13, %s1788_s5  ;;  %p1794_p1 = scmp.lt.s32.totalorder %s1788_s5, %s1788_s5 }
  0x41   :  { %p1795_p2 = por %p1794_p1, %p1793_p0 }
  0x43   :  { %p1796_p3 = pnand %p1795_p2, %p1789_p13 }
  0x45   :  { %1799 = shalt.err (!%p1796_p3)
}
  0x46   :  { %114 = dma.hbm_to_vmem [thread:$0]  %s2298_s7, 1024, %s109_s13, [#allocation15], %s1945_s23, %s1945_s23, %s1946_s24  }
  0x47   :  { %s1800_s27 = scalar_lea.hbm %s2291_s0, 128 }
  0x48   :  { %p1801_p4 = scmp.ne.s32.totalorder %s2291_s0, %s1800_s27  ;;  %p1804_p5 = scmp.lt.u32.totalorder %s1800_s27, %s2291_s0 }
  0x4a   :  { %p1806_p6 = pnand %p1804_p5, %p1801_p4 }
  0x4c   :  { %1809 = shalt.err (!%p1806_p6)
}
  0x4d   :  { %s1810_s12 = scalar_lea.vmem %s28_s16, 128  ;;  %p1815_p8 = scmp.lt.s32.totalorder %s28_s16, %s28_s16 }
  0x4e   :  { %p1811_p7 = scmp.ne.s32.totalorder %s28_s16, %s1810_s12  ;;  %p1816_p9 = scmp.lt.s32.totalorder %s1810_s12, %s1810_s12 }
  0x50   :  { %p1817_p10 = por %p1816_p9, %p1815_p8 }
  0x52   :  { %p1818_p11 = pnand %p1817_p10, %p1811_p7 }
  0x54   :  { %1821 = shalt.err (!%p1818_p11)
}
  0x55   :  { %30 = dma.hbm_to_vmem [thread:$0]  %s2291_s0, 128, %s28_s16, [#allocation3]  }
  0x56   :  { %s1951_s15 = smov [#allocation7]   ;;  %s1952_s18 = smov [#allocation10]  }
  0x57   :  { %s48_s17 = sshll.u32 %s1951_s15, 4  ;;  %s72_s1 = sshll.u32 %s1952_s18, 4  ;;  %s49_s17 = int_to_ptr.vmem [resolvable:$true] %s48_s17  ;;  %s73_s1 = int_to_ptr.vmem [resolvable:$true] %s72_s1 }
  0x58   :  { %s1822_s20 = scalar_lea.hbm %s2293_s2, 1024 }
  0x59   :  { %p1823_p12 = scmp.ne.s32.totalorder %s2293_s2, %s1822_s20  ;;  %p1826_p13 = scmp.lt.u32.totalorder %s1822_s20, %s2293_s2 }
  0x5b   :  { %p1828_p0 = pnand %p1826_p13, %p1823_p12 }
  0x5d   :  { %1831 = shalt.err (!%p1828_p0)
}
  0x5e   :  { %s1832_s0 = scalar_lea.vmem %s49_s17, 1024  ;;  %p1837_p2 = scmp.lt.s32.totalorder %s49_s17, %s49_s17 }
  0x5f   :  { %p1833_p1 = scmp.ne.s32.totalorder %s49_s17, %s1832_s0  ;;  %p1838_p3 = scmp.lt.s32.totalorder %s1832_s0, %s1832_s0 }
  0x61   :  { %p1839_p4 = por %p1838_p3, %p1837_p2 }
  0x63   :  { %p1840_p5 = pnand %p1839_p4, %p1833_p1 }
  0x65   :  { %1843 = shalt.err (!%p1840_p5)
}
  0x66   :  { %54 = dma.hbm_to_vmem [thread:$0]  %s2293_s2, 1024, %s49_s17, [#allocation6], %s1945_s23, %s1945_s23, %s1946_s24  }
  0x67   :  { %s1844_s29 = scalar_lea.hbm %s2295_s4, 1024 }
  0x68   :  { %p1845_p6 = scmp.ne.s32.totalorder %s2295_s4, %s1844_s29  ;;  %p1848_p7 = scmp.lt.u32.totalorder %s1844_s29, %s2295_s4 }
  0x6a   :  { %p1850_p8 = pnand %p1848_p7, %p1845_p6 }
  0x6c   :  { %1853 = shalt.err (!%p1850_p8)
}
  0x6d   :  { %s1854_s7 = scalar_lea.vmem %s73_s1, 1024  ;;  %p1859_p10 = scmp.lt.s32.totalorder %s73_s1, %s73_s1 }
  0x6e   :  { %p1855_p9 = scmp.ne.s32.totalorder %s73_s1, %s1854_s7  ;;  %p1860_p11 = scmp.lt.s32.totalorder %s1854_s7, %s1854_s7 }
  0x70   :  { %p1861_p12 = por %p1860_p11, %p1859_p10 }
  0x72   :  { %p1862_p13 = pnand %p1861_p12, %p1855_p9 }
  0x74   :  { %1865 = shalt.err (!%p1862_p13)
}
  0x75   :  { %78 = dma.hbm_to_vmem [thread:$0]  %s2295_s4, 1024, %s73_s1, [#allocation9], %s1945_s23, %s1945_s23, %s1946_s24  }
  0x76   :  { %s1953_s15 = smov [#allocation13]   ;;  %s1954_s18 = smov [#allocation16]  }
  0x77   :  { %s96_s17 = sshll.u32 %s1953_s15, 4  ;;  %s120_s14 = sshll.u32 %s1954_s18, 4  ;;  %s97_s17 = int_to_ptr.vmem [resolvable:$true] %s96_s17  ;;  %s121_s14 = int_to_ptr.vmem [resolvable:$true] %s120_s14 }
  0x78   :  { %s1866_s21 = scalar_lea.hbm %s2297_s6, 1024 }
  0x79   :  { %p1867_p0 = scmp.ne.s32.totalorder %s2297_s6, %s1866_s21  ;;  %p1870_p1 = scmp.lt.u32.totalorder %s1866_s21, %s2297_s6 }
  0x7b   :  { %p1872_p2 = pnand %p1870_p1, %p1867_p0 }
  0x7d   :  { %1875 = shalt.err (!%p1872_p2)
}
  0x7e   :  { %s1876_s4 = scalar_lea.vmem %s97_s17, 1024  ;;  %p1881_p4 = scmp.lt.s32.totalorder %s97_s17, %s97_s17 }
  0x7f   :  { %p1877_p3 = scmp.ne.s32.totalorder %s97_s17, %s1876_s4  ;;  %p1882_p5 = scmp.lt.s32.totalorder %s1876_s4, %s1876_s4 }
  0x81   :  { %p1883_p6 = por %p1882_p5, %p1881_p4 }
  0x83   :  { %p1884_p7 = pnand %p1883_p6, %p1877_p3 }
  0x85   :  { %1887 = shalt.err (!%p1884_p7)
}
  0x86   :  { %102 = dma.hbm_to_vmem [thread:$0]  %s2297_s6, 1024, %s97_s17, [#allocation12], %s1945_s23, %s1945_s23, %s1946_s24  }
  0x87   :  { %s1888_s27 = scalar_lea.hbm %s2299_s8, 1024 }
  0x88   :  { %p1889_p8 = scmp.ne.s32.totalorder %s2299_s8, %s1888_s27  ;;  %p1892_p9 = scmp.lt.u32.totalorder %s1888_s27, %s2299_s8 }
  0x8a   :  { %p1894_p10 = pnand %p1892_p9, %p1889_p8 }
  0x8c   :  { %1897 = shalt.err (!%p1894_p10)
}
  0x8d   :  { %s1898_s12 = scalar_lea.vmem %s121_s14, 1024  ;;  %p1903_p12 = scmp.lt.s32.totalorder %s121_s14, %s121_s14 }
  0x8e   :  { %p1899_p11 = scmp.ne.s32.totalorder %s121_s14, %s1898_s12  ;;  %p1904_p13 = scmp.lt.s32.totalorder %s1898_s12, %s1898_s12 }
  0x90   :  { %p1905_p0 = por %p1904_p13, %p1903_p12 }
  0x92   :  { %p1906_p1 = pnand %p1905_p0, %p1899_p11 }
  0x94   :  { %1909 = shalt.err (!%p1906_p1)
}
  0x95   :  { %126 = dma.hbm_to_vmem [thread:$0]  %s2299_s8, 1024, %s121_s14, [#allocation15], %s1945_s23, %s1945_s23, %s1946_s24  }
  0x96   :  { %1932 = dma.done.wait [#allocation3], 128  }
  0x97   :  { %1933 = vsyncadd [#allocation3], 4294967168 }
  0x98   :  { %1934 = dma.done.wait [#allocation6], 2048  }
  0x99   :  { %1935 = vsyncadd [#allocation6], 4294965248 }
  0x9a   :  { %1936 = dma.done.wait [#allocation9], 2048  }
  0x9b   :  { %1937 = vsyncadd [#allocation9], 4294965248 }
  0x9c   :  { %1938 = dma.done.wait [#allocation12], 2048  }
  0x9d   :  { %1939 = vsyncadd [#allocation12], 4294965248 }
  0x9e   :  { %1940 = dma.done.wait [#allocation15], 2048  }
  0x9f   :  { %1941 = vsyncadd [#allocation15], 4294965248  ;;  %v1955_v0 = vmov 24   ;;  %v2152_v1 = vld [vmem:[#allocation2] sm:$0xff]  ;;  %v1626_v2 = vld [vmem:[#allocation7] sm:$0xff]   ;;  %v1956_v4 = vmov 0.0   ;;  %v159_v19 = vlaneseq }
  0xa0   :  { %1625 = vset.pattern.permute.xlu0 %v1955_v0  ;;  %v1627_v3 = vld [vmem:[#allocation5] sm:$0xff]   ;;  %1440 = vmatprep.subr.bf16.mxu0 %v1956_v4  ;;  %v1628_v5 = vld [vmem:[#allocation7 + $0x8] sm:$0xff]   ;;  %v1630_v7 = vld [vmem:[#allocation7 + $0x10] sm:$0xff]   ;;  %vm1957_vm0 = vmmov 0   ;;  %v1958_v37 = vmov 683565275  }
  0xa1   :  { %167 = vperm.xlu0 %1625, %v2152_v1   ;;  %1460 = vmatprep.subr.bf16.mxu1 %v1956_v4  ;;  %v1629_v6 = vld [vmem:[#allocation5 + $0x8] sm:$0xff]   ;;  %v1631_v8 = vld [vmem:[#allocation5 + $0x10] sm:$0xff]   ;;  %v1632_v9 = vld [vmem:[#allocation7 + $0x18] sm:$0xff]   ;;  %v160_v20 = vand.u32 127, %v159_v19  ;;  %v1959_v39 = vmov 2475754826  }
  0xa2   :  { %1441 = vmatpush3.bf16.msra.mxu0 %v1626_v2  ;;  %1461 = vmatpush3.bf16.msra.mxu1 %v1627_v3  ;;  %v1633_v10 = vld [vmem:[#allocation5 + $0x18] sm:$0xff]   ;;  %v1634_v11 = vld [vmem:[#allocation7 + $0x20] sm:$0xff]   ;;  %v1636_v13 = vld [vmem:[#allocation7 + $0x28] sm:$0xff]   ;;  %v1960_v42 = vmov 2131351028  }
  0xa3   :  { %1442 = vmatprep.subr.bf16.mxu0 %v1956_v4  ;;  %1462 = vmatprep.subr.bf16.mxu1 %v1956_v4  ;;  %v1635_v12 = vld [vmem:[#allocation5 + $0x20] sm:$0xff]   ;;  %v1637_v14 = vld [vmem:[#allocation5 + $0x28] sm:$0xff]   ;;  %v1638_v15 = vld [vmem:[#allocation7 + $0x30] sm:$0xff]   ;;  %v161_v21 = vcvt.s32.f32 %v160_v20  ;;  %v1961_v45 = vmov 2102212464  }
  0xa4   :  { %1456 = vmatprep.mubr.msk.bf16.mxu0 %vm1957_vm0, %v1956_v4  ;;  %1476 = vmatprep.mubr.msk.bf16.mxu1 %vm1957_vm0, %v1956_v4  ;;  %v1639_v16 = vld [vmem:[#allocation5 + $0x30] sm:$0xff]   ;;  %v1640_v17 = vld [vmem:[#allocation7 + $0x38] sm:$0xff]   ;;  %v1962_v48 = vmov 920167782   ;;  %v1963_v51 = vmov 1326507024  }
  0xa5   :  { %v1641_v18 = vld [vmem:[#allocation5 + $0x38] sm:$0xff]   ;;  %v162_v22 = vmul.f32 -1.3157629, %v161_v21 }
  0xa6   :  { %1443 = vmatpush3.bf16.msra.mxu0 %v1628_v5  ;;  %1463 = vmatpush3.bf16.msra.mxu1 %v1629_v6 }
  0xa7   :  { %1444 = vmatprep.subr.bf16.mxu0 %v1956_v4  ;;  %1464 = vmatprep.subr.bf16.mxu1 %v1956_v4  ;;  %v163_v23 = vmul.f32 1.442695, %v162_v22 }
  0xa9   :  { %1690 = vpow2.f32 %v163_v23 }
  0xaa   :  { %1445 = vmatpush3.bf16.msra.mxu0 %v1630_v7  ;;  %1465 = vmatpush3.bf16.msra.mxu1 %v1631_v8 }
  0xab   :  { %1446 = vmatprep.subr.bf16.mxu0 %v1956_v4  ;;  %1466 = vmatprep.subr.bf16.mxu1 %v1956_v4 }
  0xae   :  { %1447 = vmatpush3.bf16.msra.mxu0 %v1632_v9  ;;  %1467 = vmatpush3.bf16.msra.mxu1 %v1633_v10 }
  0xaf   :  { %1448 = vmatprep.subr.bf16.mxu0 %v1956_v4  ;;  %1468 = vmatprep.subr.bf16.mxu1 %v1956_v4 }
  0xb2   :  { %1449 = vmatpush3.bf16.msra.mxu0 %v1634_v11  ;;  %1469 = vmatpush3.bf16.msra.mxu1 %v1635_v12 }
  0xb3   :  { %1450 = vmatprep.subr.bf16.mxu0 %v1956_v4  ;;  %1470 = vmatprep.subr.bf16.mxu1 %v1956_v4  ;;  %v1691_v24 = vpop.eup %1690 }
  0xb6   :  { %1451 = vmatpush3.bf16.msra.mxu0 %v1636_v13  ;;  %1471 = vmatpush3.bf16.msra.mxu1 %v1637_v14 }
  0xb7   :  { %1452 = vmatprep.subr.bf16.mxu0 %v1956_v4  ;;  %1472 = vmatprep.subr.bf16.mxu1 %v1956_v4 }
  0xba   :  { %1453 = vmatpush3.bf16.msra.mxu0 %v1638_v15  ;;  %1473 = vmatpush3.bf16.msra.mxu1 %v1639_v16 }
  0xbb   :  { %1454 = vmatprep.subr.bf16.mxu0 %v1956_v4  ;;  %1474 = vmatprep.subr.bf16.mxu1 %v1956_v4 }
  0xbe   :  { %1455 = vmatpush3.bf16.msra.mxu0 %v1640_v17  ;;  %1475 = vmatpush3.bf16.msra.mxu1 %v1641_v18 }
  0xbf   :  { %1480 = vmatprep.subr.bf16.mxu0 %v1956_v4  ;;  %1500 = vmatprep.subr.bf16.mxu1 %v1956_v4 }
 0x120   :  { %v168_v25 = vpop.permute.xlu0 %167 }
 0x121   :  { %v2178_v26 = vmul.f32 %v1691_v24, %v168_v25 }
 0x123   :  { %v174_v27 = vand.u32 2139095040, %v2178_v26  ;;  %v171_v31 = vand.u32 2147483647, %v2178_v26  ;;  %vm173_vm8 = vcmp.lt.s32.totalorder %v2178_v26, 0 }
 0x125   :  { %v175_v28 = vshrl.u32 %v174_v27, 23  ;;  %v178_v34 = vand.u32 8388607, %v171_v31  ;;  %vm172_vm9 = vcmp.le.f32.partialorder %v171_v31, 0.7853982 }
 0x127   :  { %v1292_v29 = vadd.s32 4294967169, %v175_v28  ;;  %v179_v53 = vor.u32 8388608, %v178_v34 }
 0x129   :  { %v181_v30 = vadd.s32 1, %v1292_v29  ;;  %v219_v5 = vshll.u32 %v179_v53, 8 }
 0x12b   :  { %vm182_vm1 = vcmp.gt.s32.totalorder %v181_v30, 0 }
 0x12c   :  { %v183_v32 = vsel %vm182_vm1, %v181_v30, 0  ;;  %vm263_vm1 = vweird.f32 %v2178_v26 }
 0x12d   :  { %v185_v33 = vand.u32 31, %v183_v32  ;;  %v184_v36 = vshrl.u32 %v183_v32, 5 }
 0x12f   :  { %v186_v35 = vsub.s32 32, %v185_v33  ;;  %v188_v38 = vshll.u32 %v1958_v37, %v185_v33  ;;  %v191_v40 = vshll.u32 %v1959_v39, %v185_v33  ;;  %v194_v44 = vshll.u32 %v1960_v42, %v185_v33 }
 0x130   :  { %v197_v47 = vshll.u32 %v1961_v45, %v185_v33  ;;  %v200_v50 = vshll.u32 %v1962_v48, %v185_v33  ;;  %vm203_vm2 = vcmp.lt.s32.totalorder %v184_v36, 1  ;;  %vm206_vm3 = vcmp.lt.s32.totalorder %v184_v36, 4 }
 0x131   :  { %v189_v41 = vshrl.u32 %v1959_v39, %v186_v35  ;;  %v192_v43 = vshrl.u32 %v1960_v42, %v186_v35  ;;  %v195_v46 = vshrl.u32 %v1961_v45, %v186_v35  ;;  %v198_v49 = vshrl.u32 %v1962_v48, %v186_v35 }
 0x132   :  { %v201_v52 = vshrl.u32 %v1963_v51, %v186_v35  ;;  %v187_v62 = vshrl.u32 %v1958_v37, %v186_v35  ;;  %vm205_vm4 = vcmp.lt.s32.totalorder %v184_v36, 3  ;;  %vm204_vm5 = vcmp.lt.s32.totalorder %v184_v36, 2 }
 0x133   :  { %v190_v54 = vor.u32 %v189_v41, %v188_v38  ;;  %v193_v55 = vor.u32 %v192_v43, %v191_v40  ;;  %v196_v56 = vor.u32 %v195_v46, %v194_v44  ;;  %v199_v57 = vor.u32 %v198_v49, %v197_v47 }
 0x134   :  { %v202_v58 = vor.u32 %v201_v52, %v200_v50 }
 0x135   :  { %v208_v59 = vsel %vm206_vm3, %v196_v56, 2102212464  ;;  %v211_v60 = vsel %vm203_vm2, %v190_v54, %v193_v55  ;;  %v215_v61 = vsel %vm203_vm2, %v193_v55, %v196_v56  ;;  %v212_v63 = vsel %vm206_vm3, %v199_v57, 920167782 }
 0x136   :  { %v216_v0 = vsel %vm206_vm3, %v202_v58, 1326507024  ;;  %v213_v2 = vsel %vm205_vm4, %v196_v56, %v212_v63  ;;  %v207_v6 = vsel %vm203_vm2, %v187_v62, %v190_v54  ;;  %v209_v7 = vsel %vm205_vm4, %v193_v55, %v208_v59 }
 0x137   :  { %v217_v3 = vsel %vm205_vm4, %v199_v57, %v216_v0  ;;  %v214_v8 = vsel %vm204_vm5, %v211_v60, %v213_v2  ;;  %v210_v14 = vsel %vm204_vm5, %v207_v6, %v209_v7  ;;  %v1642_v2 = vld [vmem:[#allocation8] sm:$0xff]   ;;  %v1647_v7 = vld [vmem:[#allocation8 + $0x28] sm:$0xff]  }
 0x138   :  { %v218_v9 = vsel %vm204_vm5, %v215_v61, %v217_v3  ;;  %v2187_v12 = vmul.u32.u64.low %v219_v5, %v214_v8  ;;  %v2188_v13 = vmul.u32.u64.high %v219_v5, %v214_v8, %v2187_v12  ;;  %v226_v16 = vmul.u32 %v219_v5, %v210_v14  ;;  %v1643_v3 = vld [vmem:[#allocation8 + $0x8] sm:$0xff]   ;;  %v1646_v6 = vld [vmem:[#allocation8 + $0x20] sm:$0xff]   ;;  %v1648_v8 = vld [vmem:[#allocation8 + $0x30] sm:$0xff]  }
 0x139   :  { %v2184_v10 = vmul.u32.u64.low %v219_v5, %v218_v9  ;;  %v2185_v11 = vmul.u32.u64.high %v219_v5, %v218_v9, %v2184_v10  ;;  %v1645_v5 = vld [vmem:[#allocation8 + $0x18] sm:$0xff]   ;;  %v1659_v14 = vld [vmem:[#allocation11 + $0x20] sm:$0xff]  }
 0x13a   :  { %v229_v15 = vadd.s32 1, %v2188_v13  ;;  %v1649_v9 = vld [vmem:[#allocation8 + $0x38] sm:$0xff]   ;;  %v1651_v10 = vld [vmem:[#allocation11] sm:$0xff]  }
 0x13b   :  { %vm228_vm6 = vc.u32 %v2185_v11, %v2187_v12  ;;  %v227_v30 = vadd.s32 %v2187_v12, %v2185_v11  ;;  %v1653_v11 = vld [vmem:[#allocation11 + $0x8] sm:$0xff]   ;;  %v1655_v12 = vld [vmem:[#allocation11 + $0x10] sm:$0xff]  }
 0x13c   :  { %v230_v17 = vsel %vm228_vm6, %v229_v15, %v2188_v13  ;;  %v1657_v13 = vld [vmem:[#allocation11 + $0x18] sm:$0xff]   ;;  %v1661_v15 = vld [vmem:[#allocation11 + $0x28] sm:$0xff]  }
 0x13d   :  { %v231_v18 = vadd.s32 %v230_v17, %v226_v16  ;;  %v1663_v16 = vld [vmem:[#allocation11 + $0x30] sm:$0xff]   ;;  %v2219_v17 = vshrl.u32 %v159_v19, 7 }
 0x13f   :  { %v232_v20 = vadd.s32 536870912, %v231_v18 }
 0x141   :  { %v233_v21 = vshrl.u32 %v232_v20, 30  ;;  %v2225_v20 = vld [vmem:[%s2300_s9] sm:$0xff]  ;;  %s1964_s9 = smov [#allocation17]  }
 0x142   :  { %s1279_s24 = sshll.u32 %s1964_s9, 4  ;;  %s1280_s24 = int_to_ptr.vmem [resolvable:$true] %s1279_s24 }
 0x143   :  { %v234_v22 = vshll.u32 %v233_v21, 30  ;;  %v257_v43 = vsub.s32 4, %v233_v21  ;;  %s1910_s2 = scalar_lea.vmem %s1280_s24, 128  ;;  %p1915_p3 = scmp.lt.s32.totalorder %s1280_s24, %s1280_s24 }
 0x144   :  { %p1911_p2 = scmp.ne.s32.totalorder %s1280_s24, %s1910_s2  ;;  %p1916_p4 = scmp.lt.s32.totalorder %s1910_s2, %s1910_s2 }
 0x145   :  { %v235_v23 = vsub.s32 %v231_v18, %v234_v22  ;;  %v258_v46 = vsel %vm173_vm8, %v257_v43, %v233_v21  ;;  %v590_v18 = vsub.s32 0, %v2219_v17  ;;  %v1658_v43 = vld [vmem:[#allocation10 + $0x20] sm:$0xff]  }
 0x146   :  { %v260_v48 = vsel %vm172_vm9, 0, %v258_v46  ;;  %v1664_v46 = vld [vmem:[#allocation10 + $0x38] sm:$0xff]   ;;  %p1917_p5 = por %p1916_p4, %p1915_p3 }
 0x147   :  { %v237_v24 = vsub.s32 0, %v235_v23  ;;  %v264_v49 = vadd.s32 3, %v260_v48  ;;  %v369_v50 = vand.u32 3, %v260_v48  ;;  %v591_v21 = vrot.slane %v2225_v20, %v590_v18  ;;  %v1665_v48 = vld [vmem:[#allocation11 + $0x38] sm:$0xff]  }
 0x148   :  { %p1918_p6 = pnand %p1917_p5, %p1911_p2 }
 0x149   :  { %v1293_v25 = vmin.u32 %v237_v24, %v235_v23  ;;  %v265_v51 = vand.u32 3, %v264_v49  ;;  %vm374_vm10 = vcmp.eq.s32.totalorder %v369_v50, 2  ;;  %vm371_vm12 = vcmp.eq.s32.totalorder %v369_v50, 0 }
 0x14a   :  { %vm370_vm14 = vcmp.lt.s32.totalorder %v369_v50, 2  ;;  %v619_v49 = vsub.s32 1, %v2219_v17 }
 0x14b   :  { %v239_v27 = vclz %v1293_v25  ;;  %vm270_vm11 = vcmp.eq.s32.totalorder %v265_v51, 2  ;;  %vm267_vm13 = vcmp.eq.s32.totalorder %v265_v51, 0  ;;  %vm266_vm15 = vcmp.lt.s32.totalorder %v265_v51, 2 }
 0x14c   :  { %v620_v50 = vrot.slane %v2225_v20, %v619_v49  ;;  %v1688_v49 = vld [vmem:[#allocation16 + $0x30] sm:$0xff]  }
 0x14d   :  { %v1294_v28 = vadd.s32 4294967294, %v239_v27 }
 0x14f   :  { %vm1295_vm7 = vcmp.lt.s32.totalorder %v1294_v28, 0 }
 0x150   :  { %v242_v29 = vsel %vm1295_vm7, 0, %v1294_v28 }
 0x151   :  { %v243_v32 = vsub.s32 32, %v242_v29  ;;  %v247_v33 = vsub.s32 4294967266, %v242_v29  ;;  %v244_v34 = vshll.u32 %v235_v23, %v242_v29 }
 0x153   :  { %v245_v35 = vshrl.u32 %v227_v30, %v243_v32  ;;  %v248_v36 = vadd.s32 127, %v247_v33 }
 0x155   :  { %v246_v37 = vor.u32 %v245_v35, %v244_v34  ;;  %v249_v38 = vshll.u32 %v248_v36, 23 }
 0x157   :  { %v250_v39 = vor.u32 4788187, %v249_v38  ;;  %v253_v41 = vcvt.s32.f32 %v246_v37  ;;  %v1650_v38 = vld [vmem:[#allocation10] sm:$0xff]  }
 0x159   :  { %v251_v40 = vand.u32 2147483647, %v250_v39 }
 0x15b   :  { %v254_v42 = vmul.f32 %v253_v41, %v251_v40  ;;  %v1652_v40 = vld [vmem:[#allocation10 + $0x8] sm:$0xff]   ;;  %v1654_v41 = vld [vmem:[#allocation10 + $0x10] sm:$0xff]  }
 0x15d   :  { %v255_v44 = vxor.u32 2147483648, %v254_v42 }
 0x15f   :  { %v256_v45 = vsel %vm173_vm8, %v255_v44, %v254_v42  ;;  %v1656_v42 = vld [vmem:[#allocation10 + $0x18] sm:$0xff]   ;;  %v1660_v44 = vld [vmem:[#allocation10 + $0x28] sm:$0xff]  }
 0x160   :  { %v259_v47 = vsel %vm172_vm9, %v2178_v26, %v256_v45  ;;  %v1644_v26 = vld [vmem:[#allocation8 + $0x10] sm:$0xff]  }
 0x161   :  { %1692 = vcosq.f32 %v259_v47  ;;  %v1662_v45 = vld [vmem:[#allocation10 + $0x30] sm:$0xff]  }
 0x162   :  { %1694 = vsinq.f32 %v259_v47  ;;  %v709_v47 = vpack.c.bf16 %v2152_v1, %v2152_v1 }
 0x16b   :  { %v1693_v52 = vpop.eup %1692 }
 0x16c   :  { %v1695_v53 = vpop.eup %1694  ;;  %v271_v54 = vxor.u32 2147483648, %v1693_v52 }
 0x16d   :  { %v268_v55 = vxor.u32 2147483648, %v1695_v53 }
 0x16e   :  { %v376_v56 = vsel %vm374_vm10, %v271_v54, %v1695_v53  ;;  %v272_v31 = vsel %vm270_vm11, %v271_v54, %v1695_v53 }
 0x16f   :  { %v373_v57 = vsel %vm371_vm12, %v1693_v52, %v268_v55  ;;  %v269_v58 = vsel %vm267_vm13, %v1693_v52, %v268_v55 }
 0x170   :  { %v377_v59 = vsel %vm370_vm14, %v373_v57, %v376_v56  ;;  %v273_v60 = vsel %vm266_vm15, %v269_v58, %v272_v31 }
 0x171   :  { %v378_v61 = vsel %vm263_vm1, nan, %v377_v59  ;;  %v274_v62 = vsel %vm263_vm1, nan, %v273_v60  ;;  %v1666_v59 = vld [vmem:[#allocation13] sm:$0xff]   ;;  %v1667_v60 = vld [vmem:[#allocation13 + $0x8] sm:$0xff]  }
 0x172   :  { %v379_v63 = vpack.c.bf16 %v378_v61, %v378_v61  ;;  %v275_v0 = vpack.c.bf16 %v274_v62, %v274_v62  ;;  %v1668_v61 = vld [vmem:[#allocation13 + $0x10] sm:$0xff]   ;;  %v1669_v62 = vld [vmem:[#allocation13 + $0x18] sm:$0xff]  }
 0x174   :  { %1457 = vmatmul.mubr.bf16.vlgmr.msra.gmra.mrb[0].mxu0 %v379_v63  ;;  %1477 = vmatmul.mubr.bf16.vlgmr.msra.gmra.mrb[0].mxu1 %v275_v0  ;;  %v1670_v63 = vld [vmem:[#allocation13 + $0x20] sm:$0xff]   ;;  %v1671_v0 = vld [vmem:[#allocation13 + $0x28] sm:$0xff]  }
 0x175   :  { %1496 = vmatprep.mubr.msk.bf16.mxu0 %vm1957_vm0, %v1956_v4  ;;  %1516 = vmatprep.mubr.msk.bf16.mxu1 %vm1957_vm0, %v1956_v4 }
 0x176   :  { %1481 = vmatpush3.bf16.msra.mxu0 %v1642_v2  ;;  %1501 = vmatpush3.bf16.msra.mxu1 %v1651_v10  ;;  %v1672_v2 = vld [vmem:[#allocation13 + $0x30] sm:$0xff]  }
 0x177   :  { %1482 = vmatprep.subr.bf16.mxu0 %v1956_v4  ;;  %1502 = vmatprep.subr.bf16.mxu1 %v1956_v4 }
 0x17a   :  { %1483 = vmatpush3.bf16.msra.mxu0 %v1643_v3  ;;  %1503 = vmatpush3.bf16.msra.mxu1 %v1653_v11  ;;  %v1673_v3 = vld [vmem:[#allocation13 + $0x38] sm:$0xff]  }
 0x17b   :  { %1484 = vmatprep.subr.bf16.mxu0 %v1956_v4  ;;  %1504 = vmatprep.subr.bf16.mxu1 %v1956_v4 }
 0x17e   :  { %1485 = vmatpush3.bf16.msra.mxu0 %v1644_v26  ;;  %1505 = vmatpush3.bf16.msra.mxu1 %v1655_v12  ;;  %v921_v26 = vsub.s32 2, %v2219_v17 }
 0x17f   :  { %1486 = vmatprep.subr.bf16.mxu0 %v1956_v4  ;;  %1506 = vmatprep.subr.bf16.mxu1 %v1956_v4 }
 0x182   :  { %1487 = vmatpush3.bf16.msra.mxu0 %v1645_v5  ;;  %1507 = vmatpush3.bf16.msra.mxu1 %v1657_v13  ;;  %v922_v5 = vrot.slane %v2225_v20, %v921_v26 }
 0x183   :  { %1488 = vmatprep.subr.bf16.mxu0 %v1956_v4  ;;  %1508 = vmatprep.subr.bf16.mxu1 %v1956_v4 }
 0x186   :  { %1489 = vmatpush3.bf16.msra.mxu0 %v1646_v6  ;;  %1509 = vmatpush3.bf16.msra.mxu1 %v1659_v14 }
 0x187   :  { %1490 = vmatprep.subr.bf16.mxu0 %v1956_v4  ;;  %1510 = vmatprep.subr.bf16.mxu1 %v1956_v4 }
 0x18a   :  { %1491 = vmatpush3.bf16.msra.mxu0 %v1647_v7  ;;  %1511 = vmatpush3.bf16.msra.mxu1 %v1661_v15 }
 0x18b   :  { %1492 = vmatprep.subr.bf16.mxu0 %v1956_v4  ;;  %1512 = vmatprep.subr.bf16.mxu1 %v1956_v4 }
 0x18e   :  { %1493 = vmatpush3.bf16.msra.mxu0 %v1648_v8  ;;  %1513 = vmatpush3.bf16.msra.mxu1 %v1663_v16 }
 0x18f   :  { %1494 = vmatprep.subr.bf16.mxu0 %v1956_v4  ;;  %1514 = vmatprep.subr.bf16.mxu1 %v1956_v4 }
 0x192   :  { %1495 = vmatpush3.bf16.msra.mxu0 %v1649_v9  ;;  %1515 = vmatpush3.bf16.msra.mxu1 %v1665_v48  ;;  %v1687_v48 = vld [vmem:[#allocation16 + $0x28] sm:$0xff]  }
 0x193   :  { %1520 = vmatprep.subr.bf16.mxu0 %v1956_v4  ;;  %1540 = vmatprep.subr.bf16.mxu1 %v1956_v4 }
 0x247   :  { %v494_v22 = vpop.f32.mrb[0].mxu0  ;;  %v582_v23 = vpop.f32.mrb[0].mxu1 }
 0x248   :  { %v583_v24 = vadd.f32 %v582_v23, %v494_v22  ;;  %v1458_v25 = vpop.f32.mrb[1].mxu0  ;;  %v1478_v27 = vpop.f32.mrb[1].mxu1  ;;  %v1675_v22 = vld [vmem:[#allocation14 + $0x8] sm:$0xff]   ;;  %v1676_v23 = vld [vmem:[#allocation14 + $0x10] sm:$0xff]  }
 0x249   :  { %v497_v28 = vpop.f32.mrb[2].mxu0  ;;  %v585_v29 = vpop.f32.mrb[2].mxu1  ;;  %v1678_v25 = vld [vmem:[#allocation14 + $0x20] sm:$0xff]   ;;  %v1679_v27 = vld [vmem:[#allocation14 + $0x28] sm:$0xff]  }
 0x24a   :  { %v592_v30 = vadd.f32 %v591_v21, %v583_v24  ;;  %v1459_v32 = vpop.f32.mrb[3].mxu0  ;;  %v1479_v19 = vpop.f32.mrb[3].mxu1  ;;  %v1674_v21 = vld [vmem:[#allocation14] sm:$0xff]   ;;  %v1677_v24 = vld [vmem:[#allocation14 + $0x18] sm:$0xff]   ;;  %v1680_v28 = vld [vmem:[#allocation14 + $0x30] sm:$0xff]  }
 0x24b   :  { %v1681_v29 = vld [vmem:[#allocation14 + $0x38] sm:$0xff]  }
 0x24c   :  { %v1316_v33 = vmul.f32 -1.442695, %v592_v30 }
 0x24e   :  { %1696 = vpow2.f32 %v1316_v33 }
 0x258   :  { %v1697_v34 = vpop.eup %1696 }
 0x259   :  { %v596_v35 = vadd.f32 1.0, %v1697_v34 }
 0x25b   :  { %1698 = vrcp.f32 %v596_v35 }
 0x265   :  { %v1699_v36 = vpop.eup %1698 }
 0x266   :  { %v599_v37 = vmul.f32 %v1699_v36, %v592_v30  ;;  %v950_v30 = vsub.s32 3, %v2219_v17 }
 0x268   :  { %v600_v39 = vpack.c.bf16 %v599_v37, %v599_v37  ;;  %v951_v32 = vrot.slane %v2225_v20, %v950_v30 }
 0x26a   :  { %1497 = vmatmul.mubr.bf16.vlgmr.msra.gmra.mrb[4].mxu0 %v600_v39 }
 0x26b   :  { %1521 = vmatpush3.bf16.msra.mxu0 %v1650_v38  ;;  %1536 = vmatprep.mubr.msk.bf16.mxu0 %vm1957_vm0, %v1956_v4 }
 0x26c   :  { %1522 = vmatprep.subr.bf16.mxu0 %v1956_v4 }
 0x26f   :  { %1523 = vmatpush3.bf16.msra.mxu0 %v1652_v40 }
 0x270   :  { %1524 = vmatprep.subr.bf16.mxu0 %v1956_v4 }
 0x273   :  { %1525 = vmatpush3.bf16.msra.mxu0 %v1654_v41 }
 0x274   :  { %1526 = vmatprep.subr.bf16.mxu0 %v1956_v4 }
 0x277   :  { %1527 = vmatpush3.bf16.msra.mxu0 %v1656_v42 }
 0x278   :  { %1528 = vmatprep.subr.bf16.mxu0 %v1956_v4 }
 0x27b   :  { %1529 = vmatpush3.bf16.msra.mxu0 %v1658_v43  ;;  %v1682_v43 = vld [vmem:[#allocation16] sm:$0xff]  }
 0x27c   :  { %1530 = vmatprep.subr.bf16.mxu0 %v1956_v4 }
 0x27f   :  { %1531 = vmatpush3.bf16.msra.mxu0 %v1660_v44  ;;  %v1683_v44 = vld [vmem:[#allocation16 + $0x8] sm:$0xff]  }
 0x280   :  { %1532 = vmatprep.subr.bf16.mxu0 %v1956_v4 }
 0x283   :  { %1533 = vmatpush3.bf16.msra.mxu0 %v1662_v45  ;;  %v1684_v45 = vld [vmem:[#allocation16 + $0x10] sm:$0xff]  }
 0x284   :  { %1534 = vmatprep.subr.bf16.mxu0 %v1956_v4 }
 0x287   :  { %1535 = vmatpush3.bf16.msra.mxu0 %v1664_v46  ;;  %v1685_v46 = vld [vmem:[#allocation16 + $0x18] sm:$0xff]  }
 0x288   :  { %1560 = vmatprep.subr.bf16.mxu0 %v1956_v4 }
 0x28a   :  { %1537 = vmatmul.mubr.bf16.vlgmr.msra.gmra.mrb[8].mxu0 %v709_v47  ;;  %v1686_v47 = vld [vmem:[#allocation16 + $0x20] sm:$0xff]  }
 0x28b   :  { %1576 = vmatprep.mubr.msk.bf16.mxu0 %vm1957_vm0, %v1956_v4  ;;  %1561 = vmatpush3.bf16.msra.mxu0 %v1674_v21 }
 0x28c   :  { %1562 = vmatprep.subr.bf16.mxu0 %v1956_v4 }
 0x28f   :  { %1563 = vmatpush3.bf16.msra.mxu0 %v1675_v22 }
 0x290   :  { %1564 = vmatprep.subr.bf16.mxu0 %v1956_v4 }
 0x293   :  { %1565 = vmatpush3.bf16.msra.mxu0 %v1676_v23 }
 0x294   :  { %1566 = vmatprep.subr.bf16.mxu0 %v1956_v4 }
 0x297   :  { %1567 = vmatpush3.bf16.msra.mxu0 %v1677_v24 }
 0x298   :  { %1568 = vmatprep.subr.bf16.mxu0 %v1956_v4 }
 0x29b   :  { %1569 = vmatpush3.bf16.msra.mxu0 %v1678_v25 }
 0x29c   :  { %1570 = vmatprep.subr.bf16.mxu0 %v1956_v4 }
 0x29f   :  { %1571 = vmatpush3.bf16.msra.mxu0 %v1679_v27 }
 0x2a0   :  { %1572 = vmatprep.subr.bf16.mxu0 %v1956_v4 }
 0x2a3   :  { %1573 = vmatpush3.bf16.msra.mxu0 %v1680_v28 }
 0x2a4   :  { %1574 = vmatprep.subr.bf16.mxu0 %v1956_v4 }
 0x2a7   :  { %1575 = vmatpush3.bf16.msra.mxu0 %v1681_v29 }
 0x33d   :  { %v703_v51 = vpop.f32.mrb[4].mxu0 }
 0x33e   :  { %v704_v52 = vadd.f32 %v703_v51, %v620_v50  ;;  %v1498_v53 = vpop.f32.mrb[5].mxu0  ;;  %v1689_v50 = vld [vmem:[#allocation16 + $0x38] sm:$0xff]   ;;  %v1066_v51 = vsub.s32 4, %v2219_v17 }
 0x33f   :  { %v706_v54 = vpop.f32.mrb[6].mxu0 }
 0x340   :  { %v726_v1 = vpack.c.bf16 %v704_v52, %v704_v52  ;;  %v1499_v55 = vpop.f32.mrb[7].mxu0  ;;  %v1067_v52 = vrot.slane %v2225_v20, %v1066_v51 }
 0x342   :  { %1517 = vmatmul.mubr.bf16.vlgmr.msra.gmra.mrb[4].mxu1 %v726_v1 }
 0x343   :  { %1556 = vmatprep.mubr.msk.bf16.mxu1 %vm1957_vm0, %v1956_v4  ;;  %1541 = vmatpush3.bf16.msra.mxu1 %v1666_v59 }
 0x344   :  { %1542 = vmatprep.subr.bf16.mxu1 %v1956_v4 }
 0x347   :  { %1543 = vmatpush3.bf16.msra.mxu1 %v1667_v60 }
 0x348   :  { %1544 = vmatprep.subr.bf16.mxu1 %v1956_v4 }
 0x34b   :  { %1545 = vmatpush3.bf16.msra.mxu1 %v1668_v61 }
 0x34c   :  { %1546 = vmatprep.subr.bf16.mxu1 %v1956_v4 }
 0x34f   :  { %1547 = vmatpush3.bf16.msra.mxu1 %v1669_v62 }
 0x350   :  { %1548 = vmatprep.subr.bf16.mxu1 %v1956_v4 }
 0x353   :  { %1549 = vmatpush3.bf16.msra.mxu1 %v1670_v63 }
 0x354   :  { %1550 = vmatprep.subr.bf16.mxu1 %v1956_v4 }
 0x357   :  { %1551 = vmatpush3.bf16.msra.mxu1 %v1671_v0 }
 0x358   :  { %1552 = vmatprep.subr.bf16.mxu1 %v1956_v4 }
 0x35b   :  { %1553 = vmatpush3.bf16.msra.mxu1 %v1672_v2 }
 0x35c   :  { %1554 = vmatprep.subr.bf16.mxu1 %v1956_v4 }
 0x35d   :  { %v913_v56 = vpop.f32.mrb[8].mxu0 }
 0x35e   :  { %v1538_v31 = vpop.f32.mrb[9].mxu0 }
 0x35f   :  { %v916_v57 = vpop.f32.mrb[10].mxu0  ;;  %1555 = vmatpush3.bf16.msra.mxu1 %v1673_v3 }
 0x360   :  { %v1539_v58 = vpop.f32.mrb[11].mxu0  ;;  %1580 = vmatprep.subr.bf16.mxu1 %v1956_v4 }
 0x415   :  { %v825_v6 = vpop.f32.mrb[4].mxu1 }
 0x416   :  { %v914_v7 = vadd.f32 %v913_v56, %v825_v6  ;;  %v1518_v8 = vpop.f32.mrb[5].mxu1 }
 0x417   :  { %v828_v9 = vpop.f32.mrb[6].mxu1 }
 0x418   :  { %v923_v10 = vadd.f32 %v922_v5, %v914_v7  ;;  %v1519_v11 = vpop.f32.mrb[7].mxu1 }
 0x41a   :  { %v1341_v12 = vmul.f32 -1.442695, %v923_v10 }
 0x41c   :  { %1700 = vpow2.f32 %v1341_v12 }
 0x426   :  { %v1701_v13 = vpop.eup %1700 }
 0x427   :  { %v927_v14 = vadd.f32 1.0, %v1701_v13 }
 0x429   :  { %1702 = vrcp.f32 %v927_v14 }
 0x433   :  { %v1703_v15 = vpop.eup %1702 }
 0x434   :  { %v930_v16 = vmul.f32 %v1703_v15, %v923_v10 }
 0x436   :  { %v931_v18 = vpack.c.bf16 %v930_v16, %v930_v16 }
 0x438   :  { %1557 = vmatmul.mubr.bf16.vlgmr.msra.gmra.mrb[8].mxu1 %v931_v18 }
 0x439   :  { %1596 = vmatprep.mubr.msk.bf16.mxu1 %vm1957_vm0, %v1956_v4  ;;  %1581 = vmatpush3.bf16.msra.mxu1 %v1682_v43 }
 0x43a   :  { %1582 = vmatprep.subr.bf16.mxu1 %v1956_v4 }
 0x43d   :  { %1583 = vmatpush3.bf16.msra.mxu1 %v1683_v44 }
 0x43e   :  { %1584 = vmatprep.subr.bf16.mxu1 %v1956_v4 }
 0x441   :  { %1585 = vmatpush3.bf16.msra.mxu1 %v1684_v45 }
 0x442   :  { %1586 = vmatprep.subr.bf16.mxu1 %v1956_v4 }
 0x445   :  { %1587 = vmatpush3.bf16.msra.mxu1 %v1685_v46 }
 0x446   :  { %1588 = vmatprep.subr.bf16.mxu1 %v1956_v4 }
 0x449   :  { %1589 = vmatpush3.bf16.msra.mxu1 %v1686_v47 }
 0x44a   :  { %1590 = vmatprep.subr.bf16.mxu1 %v1956_v4 }
 0x44d   :  { %1591 = vmatpush3.bf16.msra.mxu1 %v1687_v48 }
 0x44e   :  { %1592 = vmatprep.subr.bf16.mxu1 %v1956_v4 }
 0x451   :  { %1593 = vmatpush3.bf16.msra.mxu1 %v1688_v49 }
 0x452   :  { %1594 = vmatprep.subr.bf16.mxu1 %v1956_v4  ;;  %v1182_v4 = vsub.s32 5, %v2219_v17 }
 0x454   :  { %v1183_v62 = vrot.slane %v2225_v20, %v1182_v4 }
 0x455   :  { %1595 = vmatpush3.bf16.msra.mxu1 %v1689_v50 }
 0x50b   :  { %v1034_v19 = vpop.f32.mrb[8].mxu1 }
 0x50c   :  { %v1035_v33 = vadd.f32 %v1034_v19, %v951_v32  ;;  %v1558_v34 = vpop.f32.mrb[9].mxu1 }
 0x50d   :  { %v1037_v35 = vpop.f32.mrb[10].mxu1 }
 0x50e   :  { %v1350_v36 = vmul.f32 -1.442695, %v1035_v33  ;;  %v1559_v37 = vpop.f32.mrb[11].mxu1 }
 0x510   :  { %1704 = vpow2.f32 %v1350_v36 }
 0x51a   :  { %v1705_v38 = vpop.eup %1704 }
 0x51b   :  { %v1043_v39 = vadd.f32 1.0, %v1705_v38 }
 0x51d   :  { %1706 = vrcp.f32 %v1043_v39 }
 0x527   :  { %v1707_v40 = vpop.eup %1706 }
 0x528   :  { %v1046_v41 = vmul.f32 %v1707_v40, %v1035_v33 }
 0x52a   :  { %v1047_v42 = vpack.c.bf16 %v1046_v41, %v1046_v41 }
 0x52c   :  { %1577 = vmatmul.mubr.bf16.vlgmr.msra.gmra.mrb[12].mxu0 %v1047_v42 }
 0x5ff   :  { %v1150_v53 = vpop.f32.mrb[12].mxu0 }
 0x600   :  { %v1151_v54 = vadd.f32 %v1150_v53, %v1067_v52  ;;  %v1578_v1 = vpop.f32.mrb[13].mxu0 }
 0x601   :  { %v1153_v55 = vpop.f32.mrb[14].mxu0 }
 0x602   :  { %v1359_v56 = vmul.f32 -1.442695, %v1151_v54  ;;  %v1579_v31 = vpop.f32.mrb[15].mxu0 }
 0x604   :  { %1708 = vpow2.f32 %v1359_v56 }
 0x60e   :  { %v1709_v57 = vpop.eup %1708 }
 0x60f   :  { %v1159_v58 = vadd.f32 1.0, %v1709_v57 }
 0x611   :  { %1710 = vrcp.f32 %v1159_v58 }
 0x61b   :  { %v1711_v59 = vpop.eup %1710 }
 0x61c   :  { %v1162_v60 = vmul.f32 %v1711_v59, %v1151_v54 }
 0x61e   :  { %v1163_v61 = vpack.c.bf16 %v1162_v60, %v1162_v60 }
 0x620   :  { %1597 = vmatmul.mubr.bf16.vlgmr.msra.gmra.mrb[12].mxu1 %v1163_v61 }
 0x6f3   :  { %v1266_v63 = vpop.f32.mrb[12].mxu1 }
 0x6f4   :  { %v1267_v0 = vadd.f32 %v1266_v63, %v1183_v62  ;;  %v1598_v2 = vpop.f32.mrb[13].mxu1 }
 0x6f5   :  { %v1269_v3 = vpop.f32.mrb[14].mxu1 }
 0x6f6   :  { %1272 = vst [vmem:[#allocation17] sm:$0xff] %v1267_v0  ;;  %v1599_v26 = vpop.f32.mrb[15].mxu1 }
 0x6f7   :  { %1921 = shalt.err (!%p1918_p6)
}
 0x6f8   :  { %s1922_s17 = scalar_lea.hbm %s2301_s10, 128 }
 0x6f9   :  { %p1923_p7 = scmp.ne.s32.totalorder %s2301_s10, %s1922_s17  ;;  %p1926_p8 = scmp.lt.u32.totalorder %s1922_s17, %s2301_s10 }
 0x6fb   :  { %p1928_p9 = pnand %p1926_p8, %p1923_p7 }
 0x6fd   :  { %1931 = shalt.err (!%p1928_p9)
}
 0x6fe   :  { %1282 = dma.vmem_to_hbm [thread:$0]  %s1280_s24, 128, %s2301_s10, [#allocation4]  }
 0x6ff   :  { %1942 = dma.done.wait [#allocation4], 128  }
 0x700   :  { %1943 = vsyncadd [#allocation4], 4294967168 }
 0x701   :  { %1286 = vsyncpa [#allocation3], 1 }
 0x702   :  { %1287 = vsyncpa [#allocation6], 1 }
 0x703   :  { %1288 = vsyncpa [#allocation9], 1 }
 0x704   :  { %1289 = vsyncpa [#allocation12], 1 }
 0x705   :  { %1290 = vsyncpa [#allocation15], 1 }
 0x706   :  { %1291 = vsyncpa [#allocation4], 1 }

// kernel: tpu_custom_call.1
= control target key start
LH: loop header
LB: loop body
LE: loop exit
PB: predicated region body
PF: predicated region fallthrough
CT: control target
= control target key end

     0   :  { %15 = vsyncpa [#allocation3], 0  ;;  %s2291_s0 = inlined_call_operand.hbm [shape: f32[8,128], index: 0, kind: input, shape index: {}]   ;;  %s2292_s1 = inlined_call_operand.hbm [shape: bf16[128,128], index: 1, kind: input, shape index: {}]   ;;  %s2293_s2 = inlined_call_operand.hbm [shape: bf16[128,128], index: 2, kind: input, shape index: {}]   ;;  %s2294_s3 = inlined_call_operand.hbm [shape: bf16[128,128], index: 3, kind: input, shape index: {}]   ;;  %s2295_s4 = inlined_call_operand.hbm [shape: bf16[128,128], index: 4, kind: input, shape index: {}]   ;;  %s2296_s5 = inlined_call_operand.hbm [shape: bf16[128,128], index: 5, kind: input, shape index: {}]   ;;  %s2297_s6 = inlined_call_operand.hbm [shape: bf16[128,128], index: 6, kind: input, shape index: {}]   ;;  %s2298_s7 = inlined_call_operand.hbm [shape: bf16[128,128], index: 7, kind: input, shape index: {}]   ;;  %s2299_s8 = inlined_call_operand.hbm [shape: bf16[128,128], index: 8, kind: input, shape index: {}]   ;;  %s2300_s9 = inlined_call_operand.vmem [shape: f32[8,128], index: 9, kind: input, shape index: {}]   ;;  %s2301_s10 = inlined_call_operand.hbm [shape: f32[8,128], index: 10, kind: output, shape index: {}]  }
   0x1   :  { %16 = vsyncpa [#allocation6], 0 }
   0x2   :  { %17 = vsyncpa [#allocation9], 0 }
   0x3   :  { %18 = vsyncpa [#allocation12], 0 }
   0x4   :  { %19 = vsyncpa [#allocation15], 0 }
   0x5   :  { %20 = vsyncpa [#allocation4], 0  ;;  %s1944_s13 = smov [#allocation5]   ;;  %s1712_s17 = scalar_lea.hbm %s2292_s1, 1024 }
   0x6   :  { %s36_s14 = sshll.u32 %s1944_s13, 4  ;;  %p1713_p0 = scmp.ne.s32.totalorder %s2292_s1, %s1712_s17  ;;  %s37_s14 = int_to_ptr.vmem [resolvable:$true] %s36_s14 }
   0x7   :  { %p1716_p1 = scmp.lt.u32.totalorder %s1712_s17, %s2292_s1 }
   0x9   :  { %p1718_p2 = pnand %p1716_p1, %p1713_p0 }
   0xb   :  { %1721 = shalt.err (!%p1718_p2)
}
   0xc   :  { %s1722_s22 = scalar_lea.vmem %s37_s14, 1024  ;;  %p1727_p4 = scmp.lt.s32.totalorder %s37_s14, %s37_s14 }
   0xd   :  { %p1723_p3 = scmp.ne.s32.totalorder %s37_s14, %s1722_s22  ;;  %p1728_p5 = scmp.lt.s32.totalorder %s1722_s22, %s1722_s22 }
   0xf   :  { %p1729_p6 = por %p1728_p5, %p1727_p4 }
  0x11   :  { %p1730_p7 = pnand %p1729_p6, %p1723_p3 }
  0x13   :  { %1733 = shalt.err (!%p1730_p7)
}
  0x14   :  { %s1945_s23 = smov 64   ;;  %s1946_s24 = smov 4  }
  0x15   :  { %42 = dma.hbm_to_vmem [thread:$0]  %s2292_s1, 1024, %s37_s14, [#allocation6], %s1945_s23, %s1945_s23, %s1946_s24  }
  0x16   :  { %s1947_s27 = smov [#allocation8]   ;;  %s1948_s29 = smov [#allocation11]  }
  0x17   :  { %s60_s28 = sshll.u32 %s1947_s27, 4  ;;  %s84_s30 = sshll.u32 %s1948_s29, 4  ;;  %s61_s28 = int_to_ptr.vmem [resolvable:$true] %s60_s28  ;;  %s85_s30 = int_to_ptr.vmem [resolvable:$true] %s84_s30 }
  0x18   :  { %s1734_s13 = scalar_lea.hbm %s2294_s3, 1024 }
  0x19   :  { %p1735_p8 = scmp.ne.s32.totalorder %s2294_s3, %s1734_s13  ;;  %p1738_p9 = scmp.lt.u32.totalorder %s1734_s13, %s2294_s3 }
  0x1b   :  { %p1740_p10 = pnand %p1738_p9, %p1735_p8 }
  0x1d   :  { %1743 = shalt.err (!%p1740_p10)
}
  0x1e   :  { %s1744_s1 = scalar_lea.vmem %s61_s28, 1024  ;;  %p1749_p12 = scmp.lt.s32.totalorder %s61_s28, %s61_s28 }
  0x1f   :  { %p1745_p11 = scmp.ne.s32.totalorder %s61_s28, %s1744_s1  ;;  %p1750_p13 = scmp.lt.s32.totalorder %s1744_s1, %s1744_s1 }
  0x21   :  { %p1751_p0 = por %p1750_p13, %p1749_p12 }
  0x23   :  { %p1752_p1 = pnand %p1751_p0, %p1745_p11 }
  0x25   :  { %1755 = shalt.err (!%p1752_p1)
}
  0x26   :  { %66 = dma.hbm_to_vmem [thread:$0]  %s2294_s3, 1024, %s61_s28, [#allocation9], %s1945_s23, %s1945_s23, %s1946_s24  }
  0x27   :  { %s1756_s22 = scalar_lea.hbm %s2296_s5, 1024 }
  0x28   :  { %p1757_p2 = scmp.ne.s32.totalorder %s2296_s5, %s1756_s22  ;;  %p1760_p3 = scmp.lt.u32.totalorder %s1756_s22, %s2296_s5 }
  0x2a   :  { %p1762_p4 = pnand %p1760_p3, %p1757_p2 }
  0x2c   :  { %1765 = shalt.err (!%p1762_p4)
}
  0x2d   :  { %s1766_s11 = scalar_lea.vmem %s85_s30, 1024  ;;  %p1771_p6 = scmp.lt.s32.totalorder %s85_s30, %s85_s30 }
  0x2e   :  { %p1767_p5 = scmp.ne.s32.totalorder %s85_s30, %s1766_s11  ;;  %p1772_p7 = scmp.lt.s32.totalorder %s1766_s11, %s1766_s11 }
  0x30   :  { %p1773_p8 = por %p1772_p7, %p1771_p6 }
  0x32   :  { %p1774_p9 = pnand %p1773_p8, %p1767_p5 }
  0x34   :  { %1777 = shalt.err (!%p1774_p9)
}
  0x35   :  { %90 = dma.hbm_to_vmem [thread:$0]  %s2296_s5, 1024, %s85_s30, [#allocation12], %s1945_s23, %s1945_s23, %s1946_s24  }
  0x36   :  { %s1949_s12 = smov [#allocation14]   ;;  %s1950_s15 = smov [#allocation2]  }
  0x37   :  { %s108_s13 = sshll.u32 %s1949_s12, 4  ;;  %s27_s16 = sshll.u32 %s1950_s15, 4  ;;  %s109_s13 = int_to_ptr.vmem [resolvable:$true] %s108_s13  ;;  %s28_s16 = int_to_ptr.vmem [resolvable:$true] %s27_s16 }
  0x38   :  { %s1778_s1 = scalar_lea.hbm %s2298_s7, 1024 }
  0x39   :  { %p1779_p10 = scmp.ne.s32.totalorder %s2298_s7, %s1778_s1  ;;  %p1782_p11 = scmp.lt.u32.totalorder %s1778_s1, %s2298_s7 }
  0x3b   :  { %p1784_p12 = pnand %p1782_p11, %p1779_p10 }
  0x3d   :  { %1787 = shalt.err (!%p1784_p12)
}
  0x3e   :  { %s1788_s5 = scalar_lea.vmem %s109_s13, 1024  ;;  %p1793_p0 = scmp.lt.s32.totalorder %s109_s13, %s109_s13 }
  0x3f   :  { %p1789_p13 = scmp.ne.s32.totalorder %s109_s13, %s1788_s5  ;;  %p1794_p1 = scmp.lt.s32.totalorder %s1788_s5, %s1788_s5 }
  0x41   :  { %p1795_p2 = por %p1794_p1, %p1793_p0 }
  0x43   :  { %p1796_p3 = pnand %p1795_p2, %p1789_p13 }
  0x45   :  { %1799 = shalt.err (!%p1796_p3)
}
  0x46   :  { %114 = dma.hbm_to_vmem [thread:$0]  %s2298_s7, 1024, %s109_s13, [#allocation15], %s1945_s23, %s1945_s23, %s1946_s24  }
  0x47   :  { %s1800_s27 = scalar_lea.hbm %s2291_s0, 128 }
  0x48   :  { %p1801_p4 = scmp.ne.s32.totalorder %s2291_s0, %s1800_s27  ;;  %p1804_p5 = scmp.lt.u32.totalorder %s1800_s27, %s2291_s0 }
  0x4a   :  { %p1806_p6 = pnand %p1804_p5, %p1801_p4 }
  0x4c   :  { %1809 = shalt.err (!%p1806_p6)
}
  0x4d   :  { %s1810_s12 = scalar_lea.vmem %s28_s16, 128  ;;  %p1815_p8 = scmp.lt.s32.totalorder %s28_s16, %s28_s16 }
  0x4e   :  { %p1811_p7 = scmp.ne.s32.totalorder %s28_s16, %s1810_s12  ;;  %p1816_p9 = scmp.lt.s32.totalorder %s1810_s12, %s1810_s12 }
  0x50   :  { %p1817_p10 = por %p1816_p9, %p1815_p8 }
  0x52   :  { %p1818_p11 = pnand %p1817_p10, %p1811_p7 }
  0x54   :  { %1821 = shalt.err (!%p1818_p11)
}
  0x55   :  { %30 = dma.hbm_to_vmem [thread:$0]  %s2291_s0, 128, %s28_s16, [#allocation3]  }
  0x56   :  { %s1951_s15 = smov [#allocation7]   ;;  %s1952_s18 = smov [#allocation10]  }
  0x57   :  { %s48_s17 = sshll.u32 %s1951_s15, 4  ;;  %s72_s1 = sshll.u32 %s1952_s18, 4  ;;  %s49_s17 = int_to_ptr.vmem [resolvable:$true] %s48_s17  ;;  %s73_s1 = int_to_ptr.vmem [resolvable:$true] %s72_s1 }
  0x58   :  { %s1822_s20 = scalar_lea.hbm %s2293_s2, 1024 }
  0x59   :  { %p1823_p12 = scmp.ne.s32.totalorder %s2293_s2, %s1822_s20  ;;  %p1826_p13 = scmp.lt.u32.totalorder %s1822_s20, %s2293_s2 }
  0x5b   :  { %p1828_p0 = pnand %p1826_p13, %p1823_p12 }
  0x5d   :  { %1831 = shalt.err (!%p1828_p0)
}
  0x5e   :  { %s1832_s0 = scalar_lea.vmem %s49_s17, 1024  ;;  %p1837_p2 = scmp.lt.s32.totalorder %s49_s17, %s49_s17 }
  0x5f   :  { %p1833_p1 = scmp.ne.s32.totalorder %s49_s17, %s1832_s0  ;;  %p1838_p3 = scmp.lt.s32.totalorder %s1832_s0, %s1832_s0 }
  0x61   :  { %p1839_p4 = por %p1838_p3, %p1837_p2 }
  0x63   :  { %p1840_p5 = pnand %p1839_p4, %p1833_p1 }
  0x65   :  { %1843 = shalt.err (!%p1840_p5)
}
  0x66   :  { %54 = dma.hbm_to_vmem [thread:$0]  %s2293_s2, 1024, %s49_s17, [#allocation6], %s1945_s23, %s1945_s23, %s1946_s24  }
  0x67   :  { %s1844_s29 = scalar_lea.hbm %s2295_s4, 1024 }
  0x68   :  { %p1845_p6 = scmp.ne.s32.totalorder %s2295_s4, %s1844_s29  ;;  %p1848_p7 = scmp.lt.u32.totalorder %s1844_s29, %s2295_s4 }
  0x6a   :  { %p1850_p8 = pnand %p1848_p7, %p1845_p6 }
  0x6c   :  { %1853 = shalt.err (!%p1850_p8)
}
  0x6d   :  { %s1854_s7 = scalar_lea.vmem %s73_s1, 1024  ;;  %p1859_p10 = scmp.lt.s32.totalorder %s73_s1, %s73_s1 }
  0x6e   :  { %p1855_p9 = scmp.ne.s32.totalorder %s73_s1, %s1854_s7  ;;  %p1860_p11 = scmp.lt.s32.totalorder %s1854_s7, %s1854_s7 }
  0x70   :  { %p1861_p12 = por %p1860_p11, %p1859_p10 }
  0x72   :  { %p1862_p13 = pnand %p1861_p12, %p1855_p9 }
  0x74   :  { %1865 = shalt.err (!%p1862_p13)
}
  0x75   :  { %78 = dma.hbm_to_vmem [thread:$0]  %s2295_s4, 1024, %s73_s1, [#allocation9], %s1945_s23, %s1945_s23, %s1946_s24  }
  0x76   :  { %s1953_s15 = smov [#allocation13]   ;;  %s1954_s18 = smov [#allocation16]  }
  0x77   :  { %s96_s17 = sshll.u32 %s1953_s15, 4  ;;  %s120_s14 = sshll.u32 %s1954_s18, 4  ;;  %s97_s17 = int_to_ptr.vmem [resolvable:$true] %s96_s17  ;;  %s121_s14 = int_to_ptr.vmem [resolvable:$true] %s120_s14 }
  0x78   :  { %s1866_s21 = scalar_lea.hbm %s2297_s6, 1024 }
  0x79   :  { %p1867_p0 = scmp.ne.s32.totalorder %s2297_s6, %s1866_s21  ;;  %p1870_p1 = scmp.lt.u32.totalorder %s1866_s21, %s2297_s6 }
  0x7b   :  { %p1872_p2 = pnand %p1870_p1, %p1867_p0 }
  0x7d   :  { %1875 = shalt.err (!%p1872_p2)
}
  0x7e   :  { %s1876_s4 = scalar_lea.vmem %s97_s17, 1024  ;;  %p1881_p4 = scmp.lt.s32.totalorder %s97_s17, %s97_s17 }
  0x7f   :  { %p1877_p3 = scmp.ne.s32.totalorder %s97_s17, %s1876_s4  ;;  %p1882_p5 = scmp.lt.s32.totalorder %s1876_s4, %s1876_s4 }
  0x81   :  { %p1883_p6 = por %p1882_p5, %p1881_p4 }
  0x83   :  { %p1884_p7 = pnand %p1883_p6, %p1877_p3 }
  0x85   :  { %1887 = shalt.err (!%p1884_p7)
}
  0x86   :  { %102 = dma.hbm_to_vmem [thread:$0]  %s2297_s6, 1024, %s97_s17, [#allocation12], %s1945_s23, %s1945_s23, %s1946_s24  }
  0x87   :  { %s1888_s27 = scalar_lea.hbm %s2299_s8, 1024 }
  0x88   :  { %p1889_p8 = scmp.ne.s32.totalorder %s2299_s8, %s1888_s27  ;;  %p1892_p9 = scmp.lt.u32.totalorder %s1888_s27, %s2299_s8 }
  0x8a   :  { %p1894_p10 = pnand %p1892_p9, %p1889_p8 }
  0x8c   :  { %1897 = shalt.err (!%p1894_p10)
}
  0x8d   :  { %s1898_s12 = scalar_lea.vmem %s121_s14, 1024  ;;  %p1903_p12 = scmp.lt.s32.totalorder %s121_s14, %s121_s14 }
  0x8e   :  { %p1899_p11 = scmp.ne.s32.totalorder %s121_s14, %s1898_s12  ;;  %p1904_p13 = scmp.lt.s32.totalorder %s1898_s12, %s1898_s12 }
  0x90   :  { %p1905_p0 = por %p1904_p13, %p1903_p12 }
  0x92   :  { %p1906_p1 = pnand %p1905_p0, %p1899_p11 }
  0x94   :  { %1909 = shalt.err (!%p1906_p1)
}
  0x95   :  { %126 = dma.hbm_to_vmem [thread:$0]  %s2299_s8, 1024, %s121_s14, [#allocation15], %s1945_s23, %s1945_s23, %s1946_s24  }
  0x96   :  { %1932 = dma.done.wait [#allocation3], 128  }
  0x97   :  { %1933 = vsyncadd [#allocation3], 4294967168 }
  0x98   :  { %1934 = dma.done.wait [#allocation6], 2048  }
  0x99   :  { %1935 = vsyncadd [#allocation6], 4294965248 }
  0x9a   :  { %1936 = dma.done.wait [#allocation9], 2048  }
  0x9b   :  { %1937 = vsyncadd [#allocation9], 4294965248 }
  0x9c   :  { %1938 = dma.done.wait [#allocation12], 2048  }
  0x9d   :  { %1939 = vsyncadd [#allocation12], 4294965248 }
  0x9e   :  { %1940 = dma.done.wait [#allocation15], 2048  }
  0x9f   :  { %1941 = vsyncadd [#allocation15], 4294965248  ;;  %v1955_v0 = vmov 24   ;;  %v2152_v1 = vld [vmem:[#allocation2] sm:$0xff]  ;;  %v1626_v2 = vld [vmem:[#allocation7] sm:$0xff]   ;;  %v1956_v4 = vmov 0.0   ;;  %v159_v19 = vlaneseq }
  0xa0   :  { %1625 = vset.pattern.permute.xlu0 %v1955_v0  ;;  %v1627_v3 = vld [vmem:[#allocation5] sm:$0xff]   ;;  %1440 = vmatprep.subr.bf16.mxu0 %v1956_v4  ;;  %v1628_v5 = vld [vmem:[#allocation7 + $0x8] sm:$0xff]   ;;  %v1630_v7 = vld [vmem:[#allocation7 + $0x10] sm:$0xff]   ;;  %vm1957_vm0 = vmmov 0   ;;  %v1958_v37 = vmov 683565275  }
  0xa1   :  { %167 = vperm.xlu0 %1625, %v2152_v1   ;;  %1460 = vmatprep.subr.bf16.mxu1 %v1956_v4  ;;  %v1629_v6 = vld [vmem:[#allocation5 + $0x8] sm:$0xff]   ;;  %v1631_v8 = vld [vmem:[#allocation5 + $0x10] sm:$0xff]   ;;  %v1632_v9 = vld [vmem:[#allocation7 + $0x18] sm:$0xff]   ;;  %v160_v20 = vand.u32 127, %v159_v19  ;;  %v1959_v39 = vmov 2475754826  }
  0xa2   :  { %1441 = vmatpush3.bf16.msra.mxu0 %v1626_v2  ;;  %1461 = vmatpush3.bf16.msra.mxu1 %v1627_v3  ;;  %v1633_v10 = vld [vmem:[#allocation5 + $0x18] sm:$0xff]   ;;  %v1634_v11 = vld [vmem:[#allocation7 + $0x20] sm:$0xff]   ;;  %v1636_v13 = vld [vmem:[#allocation7 + $0x28] sm:$0xff]   ;;  %v1960_v42 = vmov 2131351028  }
  0xa3   :  { %1442 = vmatprep.subr.bf16.mxu0 %v1956_v4  ;;  %1462 = vmatprep.subr.bf16.mxu1 %v1956_v4  ;;  %v1635_v12 = vld [vmem:[#allocation5 + $0x20] sm:$0xff]   ;;  %v1637_v14 = vld [vmem:[#allocation5 + $0x28] sm:$0xff]   ;;  %v1638_v15 = vld [vmem:[#allocation7 + $0x30] sm:$0xff]   ;;  %v161_v21 = vcvt.s32.f32 %v160_v20  ;;  %v1961_v45 = vmov 2102212464  }
  0xa4   :  { %1456 = vmatprep.mubr.msk.bf16.mxu0 %vm1957_vm0, %v1956_v4  ;;  %1476 = vmatprep.mubr.msk.bf16.mxu1 %vm1957_vm0, %v1956_v4  ;;  %v1639_v16 = vld [vmem:[#allocation5 + $0x30] sm:$0xff]   ;;  %v1640_v17 = vld [vmem:[#allocation7 + $0x38] sm:$0xff]   ;;  %v1962_v48 = vmov 920167782   ;;  %v1963_v51 = vmov 1326507024  }
  0xa5   :  { %v1641_v18 = vld [vmem:[#allocation5 + $0x38] sm:$0xff]   ;;  %v162_v22 = vmul.f32 -1.3157629, %v161_v21 }
  0xa6   :  { %1443 = vmatpush3.bf16.msra.mxu0 %v1628_v5  ;;  %1463 = vmatpush3.bf16.msra.mxu1 %v1629_v6 }
  0xa7   :  { %1444 = vmatprep.subr.bf16.mxu0 %v1956_v4  ;;  %1464 = vmatprep.subr.bf16.mxu1 %v1956_v4  ;;  %v163_v23 = vmul.f32 1.442695, %v162_v22 }
  0xa9   :  { %1690 = vpow2.f32 %v163_v23 }
  0xaa   :  { %1445 = vmatpush3.bf16.msra.mxu0 %v1630_v7  ;;  %1465 = vmatpush3.bf16.msra.mxu1 %v1631_v8 }
  0xab   :  { %1446 = vmatprep.subr.bf16.mxu0 %v1956_v4  ;;  %1466 = vmatprep.subr.bf16.mxu1 %v1956_v4 }
  0xae   :  { %1447 = vmatpush3.bf16.msra.mxu0 %v1632_v9  ;;  %1467 = vmatpush3.bf16.msra.mxu1 %v1633_v10 }
  0xaf   :  { %1448 = vmatprep.subr.bf16.mxu0 %v1956_v4  ;;  %1468 = vmatprep.subr.bf16.mxu1 %v1956_v4 }
  0xb2   :  { %1449 = vmatpush3.bf16.msra.mxu0 %v1634_v11  ;;  %1469 = vmatpush3.bf16.msra.mxu1 %v1635_v12 }
  0xb3   :  { %1450 = vmatprep.subr.bf16.mxu0 %v1956_v4  ;;  %1470 = vmatprep.subr.bf16.mxu1 %v1956_v4  ;;  %v1691_v24 = vpop.eup %1690 }
  0xb6   :  { %1451 = vmatpush3.bf16.msra.mxu0 %v1636_v13  ;;  %1471 = vmatpush3.bf16.msra.mxu1 %v1637_v14 }
  0xb7   :  { %1452 = vmatprep.subr.bf16.mxu0 %v1956_v4  ;;  %1472 = vmatprep.subr.bf16.mxu1 %v1956_v4 }
  0xba   :  { %1453 = vmatpush3.bf16.msra.mxu0 %v1638_v15  ;;  %1473 = vmatpush3.bf16.msra.mxu1 %v1639_v16 }
  0xbb   :  { %1454 = vmatprep.subr.bf16.mxu0 %v1956_v4  ;;  %1474 = vmatprep.subr.bf16.mxu1 %v1956_v4 }
  0xbe   :  { %1455 = vmatpush3.bf16.msra.mxu0 %v1640_v17  ;;  %1475 = vmatpush3.bf16.msra.mxu1 %v1641_v18 }
  0xbf   :  { %1480 = vmatprep.subr.bf16.mxu0 %v1956_v4  ;;  %1500 = vmatprep.subr.bf16.mxu1 %v1956_v4 }
 0x120   :  { %v168_v25 = vpop.permute.xlu0 %167 }
 0x121   :  { %v2178_v26 = vmul.f32 %v1691_v24, %v168_v25 }
 0x123   :  { %v174_v27 = vand.u32 2139095040, %v2178_v26  ;;  %v171_v31 = vand.u32 2147483647, %v2178_v26  ;;  %vm173_vm8 = vcmp.lt.s32.totalorder %v2178_v26, 0 }
 0x125   :  { %v175_v28 = vshrl.u32 %v174_v27, 23  ;;  %v178_v34 = vand.u32 8388607, %v171_v31  ;;  %vm172_vm9 = vcmp.le.f32.partialorder %v171_v31, 0.7853982 }
 0x127   :  { %v1292_v29 = vadd.s32 4294967169, %v175_v28  ;;  %v179_v53 = vor.u32 8388608, %v178_v34 }
 0x129   :  { %v181_v30 = vadd.s32 1, %v1292_v29  ;;  %v219_v5 = vshll.u32 %v179_v53, 8 }
 0x12b   :  { %vm182_vm1 = vcmp.gt.s32.totalorder %v181_v30, 0 }
 0x12c   :  { %v183_v32 = vsel %vm182_vm1, %v181_v30, 0  ;;  %vm263_vm1 = vweird.f32 %v2178_v26 }
 0x12d   :  { %v185_v33 = vand.u32 31, %v183_v32  ;;  %v184_v36 = vshrl.u32 %v183_v32, 5 }
 0x12f   :  { %v186_v35 = vsub.s32 32, %v185_v33  ;;  %v188_v38 = vshll.u32 %v1958_v37, %v185_v33  ;;  %v191_v40 = vshll.u32 %v1959_v39, %v185_v33  ;;  %v194_v44 = vshll.u32 %v1960_v42, %v185_v33 }
 0x130   :  { %v197_v47 = vshll.u32 %v1961_v45, %v185_v33  ;;  %v200_v50 = vshll.u32 %v1962_v48, %v185_v33  ;;  %vm203_vm2 = vcmp.lt.s32.totalorder %v184_v36, 1  ;;  %vm206_vm3 = vcmp.lt.s32.totalorder %v184_v36, 4 }
 0x131   :  { %v189_v41 = vshrl.u32 %v1959_v39, %v186_v35  ;;  %v192_v43 = vshrl.u32 %v1960_v42, %v186_v35  ;;  %v195_v46 = vshrl.u32 %v1961_v45, %v186_v35  ;;  %v198_v49 = vshrl.u32 %v1962_v48, %v186_v35 }
 0x132   :  { %v201_v52 = vshrl.u32 %v1963_v51, %v186_v35  ;;  %v187_v62 = vshrl.u32 %v1958_v37, %v186_v35  ;;  %vm205_vm4 = vcmp.lt.s32.totalorder %v184_v36, 3  ;;  %vm204_vm5 = vcmp.lt.s32.totalorder %v184_v36, 2 }
 0x133   :  { %v190_v54 = vor.u32 %v189_v41, %v188_v38  ;;  %v193_v55 = vor.u32 %v192_v43, %v191_v40  ;;  %v196_v56 = vor.u32 %v195_v46, %v194_v44  ;;  %v199_v57 = vor.u32 %v198_v49, %v197_v47 }
 0x134   :  { %v202_v58 = vor.u32 %v201_v52, %v200_v50 }
 0x135   :  { %v208_v59 = vsel %vm206_vm3, %v196_v56, 2102212464  ;;  %v211_v60 = vsel %vm203_vm2, %v190_v54, %v193_v55  ;;  %v215_v61 = vsel %vm203_vm2, %v193_v55, %v196_v56  ;;  %v212_v63 = vsel %vm206_vm3, %v199_v57, 920167782 }
 0x136   :  { %v216_v0 = vsel %vm206_vm3, %v202_v58, 1326507024  ;;  %v213_v2 = vsel %vm205_vm4, %v196_v56, %v212_v63  ;;  %v207_v6 = vsel %vm203_vm2, %v187_v62, %v190_v54  ;;  %v209_v7 = vsel %vm205_vm4, %v193_v55, %v208_v59 }
 0x137   :  { %v217_v3 = vsel %vm205_vm4, %v199_v57, %v216_v0  ;;  %v214_v8 = vsel %vm204_vm5, %v211_v60, %v213_v2  ;;  %v210_v14 = vsel %vm204_vm5, %v207_v6, %v209_v7  ;;  %v1642_v2 = vld [vmem:[#allocation8] sm:$0xff]   ;;  %v1647_v7 = vld [vmem:[#allocation8 + $0x28] sm:$0xff]  }
 0x138   :  { %v218_v9 = vsel %vm204_vm5, %v215_v61, %v217_v3  ;;  %v2187_v12 = vmul.u32.u64.low %v219_v5, %v214_v8  ;;  %v2188_v13 = vmul.u32.u64.high %v219_v5, %v214_v8, %v2187_v12  ;;  %v226_v16 = vmul.u32 %v219_v5, %v210_v14  ;;  %v1643_v3 = vld [vmem:[#allocation8 + $0x8] sm:$0xff]   ;;  %v1646_v6 = vld [vmem:[#allocation8 + $0x20] sm:$0xff]   ;;  %v1648_v8 = vld [vmem:[#allocation8 + $0x30] sm:$0xff]  }
 0x139   :  { %v2184_v10 = vmul.u32.u64.low %v219_v5, %v218_v9  ;;  %v2185_v11 = vmul.u32.u64.high %v219_v5, %v218_v9, %v2184_v10  ;;  %v1645_v5 = vld [vmem:[#allocation8 + $0x18] sm:$0xff]   ;;  %v1659_v14 = vld [vmem:[#allocation11 + $0x20] sm:$0xff]  }
 0x13a   :  { %v229_v15 = vadd.s32 1, %v2188_v13  ;;  %v1649_v9 = vld [vmem:[#allocation8 + $0x38] sm:$0xff]   ;;  %v1651_v10 = vld [vmem:[#allocation11] sm:$0xff]  }
 0x13b   :  { %vm228_vm6 = vc.u32 %v2185_v11, %v2187_v12  ;;  %v227_v30 = vadd.s32 %v2187_v12, %v2185_v11  ;;  %v1653_v11 = vld [vmem:[#allocation11 + $0x8] sm:$0xff]   ;;  %v1655_v12 = vld [vmem:[#allocation11 + $0x10] sm:$0xff]  }
 0x13c   :  { %v230_v17 = vsel %vm228_vm6, %v229_v15, %v2188_v13  ;;  %v1657_v13 = vld [vmem:[#allocation11 + $0x18] sm:$0xff]   ;;  %v1661_v15 = vld [vmem:[#allocation11 + $0x28] sm:$0xff]  }
 0x13d   :  { %v231_v18 = vadd.s32 %v230_v17, %v226_v16  ;;  %v1663_v16 = vld [vmem:[#allocation11 + $0x30] sm:$0xff]   ;;  %v2219_v17 = vshrl.u32 %v159_v19, 7 }
 0x13f   :  { %v232_v20 = vadd.s32 536870912, %v231_v18 }
 0x141   :  { %v233_v21 = vshrl.u32 %v232_v20, 30  ;;  %v2225_v20 = vld [vmem:[%s2300_s9] sm:$0xff]  ;;  %s1964_s9 = smov [#allocation17]  }
 0x142   :  { %s1279_s24 = sshll.u32 %s1964_s9, 4  ;;  %s1280_s24 = int_to_ptr.vmem [resolvable:$true] %s1279_s24 }
 0x143   :  { %v234_v22 = vshll.u32 %v233_v21, 30  ;;  %v257_v43 = vsub.s32 4, %v233_v21  ;;  %s1910_s2 = scalar_lea.vmem %s1280_s24, 128  ;;  %p1915_p3 = scmp.lt.s32.totalorder %s1280_s24, %s1280_s24 }
 0x144   :  { %p1911_p2 = scmp.ne.s32.totalorder %s1280_s24, %s1910_s2  ;;  %p1916_p4 = scmp.lt.s32.totalorder %s1910_s2, %s1910_s2 }
 0x145   :  { %v235_v23 = vsub.s32 %v231_v18, %v234_v22  ;;  %v258_v46 = vsel %vm173_vm8, %v257_v43, %v233_v21  ;;  %v590_v18 = vsub.s32 0, %v2219_v17  ;;  %v1658_v43 = vld [vmem:[#allocation10 + $0x20] sm:$0xff]  }
 0x146   :  { %v260_v48 = vsel %vm172_vm9, 0, %v258_v46  ;;  %v1664_v46 = vld [vmem:[#allocation10 + $0x38] sm:$0xff]   ;;  %p1917_p5 = por %p1916_p4, %p1915_p3 }
 0x147   :  { %v237_v24 = vsub.s32 0, %v235_v23  ;;  %v264_v49 = vadd.s32 3, %v260_v48  ;;  %v369_v50 = vand.u32 3, %v260_v48  ;;  %v591_v21 = vrot.slane %v2225_v20, %v590_v18  ;;  %v1665_v48 = vld [vmem:[#allocation11 + $0x38] sm:$0xff]  }
 0x148   :  { %p1918_p6 = pnand %p1917_p5, %p1911_p2 }
 0x149   :  { %v1293_v25 = vmin.u32 %v237_v24, %v235_v23  ;;  %v265_v51 = vand.u32 3, %v264_v49  ;;  %vm374_vm10 = vcmp.eq.s32.totalorder %v369_v50, 2  ;;  %vm371_vm12 = vcmp.eq.s32.totalorder %v369_v50, 0 }
 0x14a   :  { %vm370_vm14 = vcmp.lt.s32.totalorder %v369_v50, 2  ;;  %v619_v49 = vsub.s32 1, %v2219_v17 }
 0x14b   :  { %v239_v27 = vclz %v1293_v25  ;;  %vm270_vm11 = vcmp.eq.s32.totalorder %v265_v51, 2  ;;  %vm267_vm13 = vcmp.eq.s32.totalorder %v265_v51, 0  ;;  %vm266_vm15 = vcmp.lt.s32.totalorder %v265_v51, 2 }
 0x14c   :  { %v620_v50 = vrot.slane %v2225_v20, %v619_v49  ;;  %v1688_v49 = vld [vmem:[#allocation16 + $0x30] sm:$0xff]  }
 0x14d   :  { %v1294_v28 = vadd.s32 4294967294, %v239_v27 }
 0x14f   :  { %vm1295_vm7 = vcmp.lt.s32.totalorder %v1294_v28, 0 }
 0x150   :  { %v242_v29 = vsel %vm1295_vm7, 0, %v1294_v28 }
 0x151   :  { %v243_v32 = vsub.s32 32, %v242_v29  ;;  %v247_v33 = vsub.s32 4294967266, %v242_v29  ;;  %v244_v34 = vshll.u32 %v235_v23, %v242_v29 }
 0x153   :  { %v245_v35 = vshrl.u32 %v227_v30, %v243_v32  ;;  %v248_v36 = vadd.s32 127, %v247_v33 }
 0x155   :  { %v246_v37 = vor.u32 %v245_v35, %v244_v34  ;;  %v249_v38 = vshll.u32 %v248_v36, 23 }
 0x157   :  { %v250_v39 = vor.u32 4788187, %v249_v38  ;;  %v253_v41 = vcvt.s32.f32 %v246_v37  ;;  %v1650_v38 = vld [vmem:[#allocation10] sm:$0xff]  }
 0x159   :  { %v251_v40 = vand.u32 2147483647, %v250_v39 }
 0x15b   :  { %v254_v42 = vmul.f32 %v253_v41, %v251_v40  ;;  %v1652_v40 = vld [vmem:[#allocation10 + $0x8] sm:$0xff]   ;;  %v1654_v41 = vld [vmem:[#allocation10 + $0x10] sm:$0xff]  }
 0x15d   :  { %v255_v44 = vxor.u32 2147483648, %v254_v42 }
 0x15f   :  { %v256_v45 = vsel %vm173_vm8, %v255_v44, %v254_v42  ;;  %v1656_v42 = vld [vmem:[#allocation10 + $0x18] sm:$0xff]   ;;  %v1660_v44 = vld [vmem:[#allocation10 + $0x28] sm:$0xff]  }
 0x160   :  { %v259_v47 = vsel %vm172_vm9, %v2178_v26, %v256_v45  ;;  %v1644_v26 = vld [vmem:[#allocation8 + $0x10] sm:$0xff]  }
 0x161   :  { %1692 = vcosq.f32 %v259_v47  ;;  %v1662_v45 = vld [vmem:[#allocation10 + $0x30] sm:$0xff]  }
 0x162   :  { %1694 = vsinq.f32 %v259_v47  ;;  %v709_v47 = vpack.c.bf16 %v2152_v1, %v2152_v1 }
 0x16b   :  { %v1693_v52 = vpop.eup %1692 }
 0x16c   :  { %v1695_v53 = vpop.eup %1694  ;;  %v271_v54 = vxor.u32 2147483648, %v1693_v52 }
 0x16d   :  { %v268_v55 = vxor.u32 2147483648, %v1695_v53 }
 0x16e   :  { %v376_v56 = vsel %vm374_vm10, %v271_v54, %v1695_v53  ;;  %v272_v31 = vsel %vm270_vm11, %v271_v54, %v1695_v53 }
 0x16f   :  { %v373_v57 = vsel %vm371_vm12, %v1693_v52, %v268_v55  ;;  %v269_v58 = vsel %vm267_vm13, %v1693_v52, %v268_v55 }
 0x170   :  { %v377_v59 = vsel %vm370_vm14, %v373_v57, %v376_v56  ;;  %v273_v60 = vsel %vm266_vm15, %v269_v58, %v272_v31 }
 0x171   :  { %v378_v61 = vsel %vm263_vm1, nan, %v377_v59  ;;  %v274_v62 = vsel %vm263_vm1, nan, %v273_v60  ;;  %v1666_v59 = vld [vmem:[#allocation13] sm:$0xff]   ;;  %v1667_v60 = vld [vmem:[#allocation13 + $0x8] sm:$0xff]  }
 0x172   :  { %v379_v63 = vpack.c.bf16 %v378_v61, %v378_v61  ;;  %v275_v0 = vpack.c.bf16 %v274_v62, %v274_v62  ;;  %v1668_v61 = vld [vmem:[#allocation13 + $0x10] sm:$0xff]   ;;  %v1669_v62 = vld [vmem:[#allocation13 + $0x18] sm:$0xff]  }
 0x174   :  { %1457 = vmatmul.mubr.bf16.vlgmr.msra.gmra.mrb[0].mxu0 %v379_v63  ;;  %1477 = vmatmul.mubr.bf16.vlgmr.msra.gmra.mrb[0].mxu1 %v275_v0  ;;  %v1670_v63 = vld [vmem:[#allocation13 + $0x20] sm:$0xff]   ;;  %v1671_v0 = vld [vmem:[#allocation13 + $0x28] sm:$0xff]  }
 0x175   :  { %1496 = vmatprep.mubr.msk.bf16.mxu0 %vm1957_vm0, %v1956_v4  ;;  %1516 = vmatprep.mubr.msk.bf16.mxu1 %vm1957_vm0, %v1956_v4 }
 0x176   :  { %1481 = vmatpush3.bf16.msra.mxu0 %v1642_v2  ;;  %1501 = vmatpush3.bf16.msra.mxu1 %v1651_v10  ;;  %v1672_v2 = vld [vmem:[#allocation13 + $0x30] sm:$0xff]  }
 0x177   :  { %1482 = vmatprep.subr.bf16.mxu0 %v1956_v4  ;;  %1502 = vmatprep.subr.bf16.mxu1 %v1956_v4 }
 0x17a   :  { %1483 = vmatpush3.bf16.msra.mxu0 %v1643_v3  ;;  %1503 = vmatpush3.bf16.msra.mxu1 %v1653_v11  ;;  %v1673_v3 = vld [vmem:[#allocation13 + $0x38] sm:$0xff]  }
 0x17b   :  { %1484 = vmatprep.subr.bf16.mxu0 %v1956_v4  ;;  %1504 = vmatprep.subr.bf16.mxu1 %v1956_v4 }
 0x17e   :  { %1485 = vmatpush3.bf16.msra.mxu0 %v1644_v26  ;;  %1505 = vmatpush3.bf16.msra.mxu1 %v1655_v12  ;;  %v921_v26 = vsub.s32 2, %v2219_v17 }
 0x17f   :  { %1486 = vmatprep.subr.bf16.mxu0 %v1956_v4  ;;  %1506 = vmatprep.subr.bf16.mxu1 %v1956_v4 }
 0x182   :  { %1487 = vmatpush3.bf16.msra.mxu0 %v1645_v5  ;;  %1507 = vmatpush3.bf16.msra.mxu1 %v1657_v13  ;;  %v922_v5 = vrot.slane %v2225_v20, %v921_v26 }
 0x183   :  { %1488 = vmatprep.subr.bf16.mxu0 %v1956_v4  ;;  %1508 = vmatprep.subr.bf16.mxu1 %v1956_v4 }
 0x186   :  { %1489 = vmatpush3.bf16.msra.mxu0 %v1646_v6  ;;  %1509 = vmatpush3.bf16.msra.mxu1 %v1659_v14 }
 0x187   :  { %1490 = vmatprep.subr.bf16.mxu0 %v1956_v4  ;;  %1510 = vmatprep.subr.bf16.mxu1 %v1956_v4 }
 0x18a   :  { %1491 = vmatpush3.bf16.msra.mxu0 %v1647_v7  ;;  %1511 = vmatpush3.bf16.msra.mxu1 %v1661_v15 }
 0x18b   :  { %1492 = vmatprep.subr.bf16.mxu0 %v1956_v4  ;;  %1512 = vmatprep.subr.bf16.mxu1 %v1956_v4 }
 0x18e   :  { %1493 = vmatpush3.bf16.msra.mxu0 %v1648_v8  ;;  %1513 = vmatpush3.bf16.msra.mxu1 %v1663_v16 }
 0x18f   :  { %1494 = vmatprep.subr.bf16.mxu0 %v1956_v4  ;;  %1514 = vmatprep.subr.bf16.mxu1 %v1956_v4 }
 0x192   :  { %1495 = vmatpush3.bf16.msra.mxu0 %v1649_v9  ;;  %1515 = vmatpush3.bf16.msra.mxu1 %v1665_v48  ;;  %v1687_v48 = vld [vmem:[#allocation16 + $0x28] sm:$0xff]  }
 0x193   :  { %1520 = vmatprep.subr.bf16.mxu0 %v1956_v4  ;;  %1540 = vmatprep.subr.bf16.mxu1 %v1956_v4 }
 0x247   :  { %v494_v22 = vpop.f32.mrb[0].mxu0  ;;  %v582_v23 = vpop.f32.mrb[0].mxu1 }
 0x248   :  { %v583_v24 = vadd.f32 %v582_v23, %v494_v22  ;;  %v1458_v25 = vpop.f32.mrb[1].mxu0  ;;  %v1478_v27 = vpop.f32.mrb[1].mxu1  ;;  %v1675_v22 = vld [vmem:[#allocation14 + $0x8] sm:$0xff]   ;;  %v1676_v23 = vld [vmem:[#allocation14 + $0x10] sm:$0xff]  }
 0x249   :  { %v497_v28 = vpop.f32.mrb[2].mxu0  ;;  %v585_v29 = vpop.f32.mrb[2].mxu1  ;;  %v1678_v25 = vld [vmem:[#allocation14 + $0x20] sm:$0xff]   ;;  %v1679_v27 = vld [vmem:[#allocation14 + $0x28] sm:$0xff]  }
 0x24a   :  { %v592_v30 = vadd.f32 %v591_v21, %v583_v24  ;;  %v1459_v32 = vpop.f32.mrb[3].mxu0  ;;  %v1479_v19 = vpop.f32.mrb[3].mxu1  ;;  %v1674_v21 = vld [vmem:[#allocation14] sm:$0xff]   ;;  %v1677_v24 = vld [vmem:[#allocation14 + $0x18] sm:$0xff]   ;;  %v1680_v28 = vld [vmem:[#allocation14 + $0x30] sm:$0xff]  }
 0x24b   :  { %v1681_v29 = vld [vmem:[#allocation14 + $0x38] sm:$0xff]  }
 0x24c   :  { %v1316_v33 = vmul.f32 -1.442695, %v592_v30 }
 0x24e   :  { %1696 = vpow2.f32 %v1316_v33 }
 0x258   :  { %v1697_v34 = vpop.eup %1696 }
 0x259   :  { %v596_v35 = vadd.f32 1.0, %v1697_v34 }
 0x25b   :  { %1698 = vrcp.f32 %v596_v35 }
 0x265   :  { %v1699_v36 = vpop.eup %1698 }
 0x266   :  { %v599_v37 = vmul.f32 %v1699_v36, %v592_v30  ;;  %v950_v30 = vsub.s32 3, %v2219_v17 }
 0x268   :  { %v600_v39 = vpack.c.bf16 %v599_v37, %v599_v37  ;;  %v951_v32 = vrot.slane %v2225_v20, %v950_v30 }
 0x26a   :  { %1497 = vmatmul.mubr.bf16.vlgmr.msra.gmra.mrb[4].mxu0 %v600_v39 }
 0x26b   :  { %1521 = vmatpush3.bf16.msra.mxu0 %v1650_v38  ;;  %1536 = vmatprep.mubr.msk.bf16.mxu0 %vm1957_vm0, %v1956_v4 }
 0x26c   :  { %1522 = vmatprep.subr.bf16.mxu0 %v1956_v4 }
 0x26f   :  { %1523 = vmatpush3.bf16.msra.mxu0 %v1652_v40 }
 0x270   :  { %1524 = vmatprep.subr.bf16.mxu0 %v1956_v4 }
 0x273   :  { %1525 = vmatpush3.bf16.msra.mxu0 %v1654_v41 }
 0x274   :  { %1526 = vmatprep.subr.bf16.mxu0 %v1956_v4 }
 0x277   :  { %1527 = vmatpush3.bf16.msra.mxu0 %v1656_v42 }
 0x278   :  { %1528 = vmatprep.subr.bf16.mxu0 %v1956_v4 }
 0x27b   :  { %1529 = vmatpush3.bf16.msra.mxu0 %v1658_v43  ;;  %v1682_v43 = vld [vmem:[#allocation16] sm:$0xff]  }
 0x27c   :  { %1530 = vmatprep.subr.bf16.mxu0 %v1956_v4 }
 0x27f   :  { %1531 = vmatpush3.bf16.msra.mxu0 %v1660_v44  ;;  %v1683_v44 = vld [vmem:[#allocation16 + $0x8] sm:$0xff]  }
 0x280   :  { %1532 = vmatprep.subr.bf16.mxu0 %v1956_v4 }
 0x283   :  { %1533 = vmatpush3.bf16.msra.mxu0 %v1662_v45  ;;  %v1684_v45 = vld [vmem:[#allocation16 + $0x10] sm:$0xff]  }
 0x284   :  { %1534 = vmatprep.subr.bf16.mxu0 %v1956_v4 }
 0x287   :  { %1535 = vmatpush3.bf16.msra.mxu0 %v1664_v46  ;;  %v1685_v46 = vld [vmem:[#allocation16 + $0x18] sm:$0xff]  }
 0x288   :  { %1560 = vmatprep.subr.bf16.mxu0 %v1956_v4 }
 0x28a   :  { %1537 = vmatmul.mubr.bf16.vlgmr.msra.gmra.mrb[8].mxu0 %v709_v47  ;;  %v1686_v47 = vld [vmem:[#allocation16 + $0x20] sm:$0xff]  }
 0x28b   :  { %1576 = vmatprep.mubr.msk.bf16.mxu0 %vm1957_vm0, %v1956_v4  ;;  %1561 = vmatpush3.bf16.msra.mxu0 %v1674_v21 }
 0x28c   :  { %1562 = vmatprep.subr.bf16.mxu0 %v1956_v4 }
 0x28f   :  { %1563 = vmatpush3.bf16.msra.mxu0 %v1675_v22 }
 0x290   :  { %1564 = vmatprep.subr.bf16.mxu0 %v1956_v4 }
 0x293   :  { %1565 = vmatpush3.bf16.msra.mxu0 %v1676_v23 }
 0x294   :  { %1566 = vmatprep.subr.bf16.mxu0 %v1956_v4 }
 0x297   :  { %1567 = vmatpush3.bf16.msra.mxu0 %v1677_v24 }
 0x298   :  { %1568 = vmatprep.subr.bf16.mxu0 %v1956_v4 }
 0x29b   :  { %1569 = vmatpush3.bf16.msra.mxu0 %v1678_v25 }
 0x29c   :  { %1570 = vmatprep.subr.bf16.mxu0 %v1956_v4 }
 0x29f   :  { %1571 = vmatpush3.bf16.msra.mxu0 %v1679_v27 }
 0x2a0   :  { %1572 = vmatprep.subr.bf16.mxu0 %v1956_v4 }
 0x2a3   :  { %1573 = vmatpush3.bf16.msra.mxu0 %v1680_v28 }
 0x2a4   :  { %1574 = vmatprep.subr.bf16.mxu0 %v1956_v4 }
 0x2a7   :  { %1575 = vmatpush3.bf16.msra.mxu0 %v1681_v29 }
 0x33d   :  { %v703_v51 = vpop.f32.mrb[4].mxu0 }
 0x33e   :  { %v704_v52 = vadd.f32 %v703_v51, %v620_v50  ;;  %v1498_v53 = vpop.f32.mrb[5].mxu0  ;;  %v1689_v50 = vld [vmem:[#allocation16 + $0x38] sm:$0xff]   ;;  %v1066_v51 = vsub.s32 4, %v2219_v17 }
 0x33f   :  { %v706_v54 = vpop.f32.mrb[6].mxu0 }
 0x340   :  { %v726_v1 = vpack.c.bf16 %v704_v52, %v704_v52  ;;  %v1499_v55 = vpop.f32.mrb[7].mxu0  ;;  %v1067_v52 = vrot.slane %v2225_v20, %v1066_v51 }
 0x342   :  { %1517 = vmatmul.mubr.bf16.vlgmr.msra.gmra.mrb[4].mxu1 %v726_v1 }
 0x343   :  { %1556 = vmatprep.mubr.msk.bf16.mxu1 %vm1957_vm0, %v1956_v4  ;;  %1541 = vmatpush3.bf16.msra.mxu1 %v1666_v59 }
 0x344   :  { %1542 = vmatprep.subr.bf16.mxu1 %v1956_v4 }
 0x347   :  { %1543 = vmatpush3.bf16.msra.mxu1 %v1667_v60 }
 0x348   :  { %1544 = vmatprep.subr.bf16.mxu1 %v1956_v4 }
 0x34b   :  { %1545 = vmatpush3.bf16.msra.mxu1 %v1668_v61 }
 0x34c   :  { %1546 = vmatprep.subr.bf16.mxu1 %v1956_v4 }
 0x34f   :  { %1547 = vmatpush3.bf16.msra.mxu1 %v1669_v62 }
 0x350   :  { %1548 = vmatprep.subr.bf16.mxu1 %v1956_v4 }
 0x353   :  { %1549 = vmatpush3.bf16.msra.mxu1 %v1670_v63 }
 0x354   :  { %1550 = vmatprep.subr.bf16.mxu1 %v1956_v4 }
 0x357   :  { %1551 = vmatpush3.bf16.msra.mxu1 %v1671_v0 }
 0x358   :  { %1552 = vmatprep.subr.bf16.mxu1 %v1956_v4 }
 0x35b   :  { %1553 = vmatpush3.bf16.msra.mxu1 %v1672_v2 }
 0x35c   :  { %1554 = vmatprep.subr.bf16.mxu1 %v1956_v4 }
 0x35d   :  { %v913_v56 = vpop.f32.mrb[8].mxu0 }
 0x35e   :  { %v1538_v31 = vpop.f32.mrb[9].mxu0 }
 0x35f   :  { %v916_v57 = vpop.f32.mrb[10].mxu0  ;;  %1555 = vmatpush3.bf16.msra.mxu1 %v1673_v3 }
 0x360   :  { %v1539_v58 = vpop.f32.mrb[11].mxu0  ;;  %1580 = vmatprep.subr.bf16.mxu1 %v1956_v4 }
 0x415   :  { %v825_v6 = vpop.f32.mrb[4].mxu1 }
 0x416   :  { %v914_v7 = vadd.f32 %v913_v56, %v825_v6  ;;  %v1518_v8 = vpop.f32.mrb[5].mxu1 }
 0x417   :  { %v828_v9 = vpop.f32.mrb[6].mxu1 }
 0x418   :  { %v923_v10 = vadd.f32 %v922_v5, %v914_v7  ;;  %v1519_v11 = vpop.f32.mrb[7].mxu1 }
 0x41a   :  { %v1341_v12 = vmul.f32 -1.442695, %v923_v10 }
 0x41c   :  { %1700 = vpow2.f32 %v1341_v12 }
 0x426   :  { %v1701_v13 = vpop.eup %1700 }
 0x427   :  { %v927_v14 = vadd.f32 1.0, %v1701_v13 }
 0x429   :  { %1702 = vrcp.f32 %v927_v14 }
 0x433   :  { %v1703_v15 = vpop.eup %1702 }
 0x434   :  { %v930_v16 = vmul.f32 %v1703_v15, %v923_v10 }
 0x436   :  { %v931_v18 = vpack.c.bf16 %v930_v16, %v930_v16 }
 0x438   :  { %1557 = vmatmul.mubr.bf16.vlgmr.msra.gmra.mrb[8].mxu1 %v931_v18 }
 0x439   :  { %1596 = vmatprep.mubr.msk.bf16.mxu1 %vm1957_vm0, %v1956_v4  ;;  %1581 = vmatpush3.bf16.msra.mxu1 %v1682_v43 }
 0x43a   :  { %1582 = vmatprep.subr.bf16.mxu1 %v1956_v4 }
 0x43d   :  { %1583 = vmatpush3.bf16.msra.mxu1 %v1683_v44 }
 0x43e   :  { %1584 = vmatprep.subr.bf16.mxu1 %v1956_v4 }
 0x441   :  { %1585 = vmatpush3.bf16.msra.mxu1 %v1684_v45 }
 0x442   :  { %1586 = vmatprep.subr.bf16.mxu1 %v1956_v4 }
 0x445   :  { %1587 = vmatpush3.bf16.msra.mxu1 %v1685_v46 }
 0x446   :  { %1588 = vmatprep.subr.bf16.mxu1 %v1956_v4 }
 0x449   :  { %1589 = vmatpush3.bf16.msra.mxu1 %v1686_v47 }
 0x44a   :  { %1590 = vmatprep.subr.bf16.mxu1 %v1956_v4 }
 0x44d   :  { %1591 = vmatpush3.bf16.msra.mxu1 %v1687_v48 }
 0x44e   :  { %1592 = vmatprep.subr.bf16.mxu1 %v1956_v4 }
 0x451   :  { %1593 = vmatpush3.bf16.msra.mxu1 %v1688_v49 }
 0x452   :  { %1594 = vmatprep.subr.bf16.mxu1 %v1956_v4  ;;  %v1182_v4 = vsub.s32 5, %v2219_v17 }
 0x454   :  { %v1183_v62 = vrot.slane %v2225_v20, %v1182_v4 }
 0x455   :  { %1595 = vmatpush3.bf16.msra.mxu1 %v1689_v50 }
 0x50b   :  { %v1034_v19 = vpop.f32.mrb[8].mxu1 }
 0x50c   :  { %v1035_v33 = vadd.f32 %v1034_v19, %v951_v32  ;;  %v1558_v34 = vpop.f32.mrb[9].mxu1 }
 0x50d   :  { %v1037_v35 = vpop.f32.mrb[10].mxu1 }
 0x50e   :  { %v1350_v36 = vmul.f32 -1.442695, %v1035_v33  ;;  %v1559_v37 = vpop.f32.mrb[11].mxu1 }
 0x510   :  { %1704 = vpow2.f32 %v1350_v36 }
 0x51a   :  { %v1705_v38 = vpop.eup %1704 }
 0x51b   :  { %v1043_v39 = vadd.f32 1.0, %v1705_v38 }
 0x51d   :  { %1706 = vrcp.f32 %v1043_v39 }
 0x527   :  { %v1707_v40 = vpop.eup %1706 }
 0x528   :  { %v1046_v41 = vmul.f32 %v1707_v40, %v1035_v33 }
 0x52a   :  { %v1047_v42 = vpack.c.bf16 %v1046_v41, %v1046_v41 }
 0x52c   :  { %1577 = vmatmul.mubr.bf16.vlgmr.msra.gmra.mrb[12].mxu0 %v1047_v42 }
 0x5ff   :  { %v1150_v53 = vpop.f32.mrb[12].mxu0 }
 0x600   :  { %v1151_v54 = vadd.f32 %v1150_v53, %v1067_v52  ;;  %v1578_v1 = vpop.f32.mrb[13].mxu0 }
 0x601   :  { %v1153_v55 = vpop.f32.mrb[14].mxu0 }
 0x602   :  { %v1359_v56 = vmul.f32 -1.442695, %v1151_v54  ;;  %v1579_v31 = vpop.f32.mrb[15].mxu0 }
 0x604   :  { %1708 = vpow2.f32 %v1359_v56 }
 0x60e   :  { %v1709_v57 = vpop.eup %1708 }
 0x60f   :  { %v1159_v58 = vadd.f32 1.0, %v1709_v57 }
 0x611   :  { %1710 = vrcp.f32 %v1159_v58 }
 0x61b   :  { %v1711_v59 = vpop.eup %1710 }
 0x61c   :  { %v1162_v60 = vmul.f32 %v1711_v59, %v1151_v54 }
 0x61e   :  { %v1163_v61 = vpack.c.bf16 %v1162_v60, %v1162_v60 }
 0x620   :  { %1597 = vmatmul.mubr.bf16.vlgmr.msra.gmra.mrb[12].mxu1 %v1163_v61 }
 0x6f3   :  { %v1266_v63 = vpop.f32.mrb[12].mxu1 }
 0x6f4   :  { %v1267_v0 = vadd.f32 %v1266_v63, %v1183_v62  ;;  %v1598_v2 = vpop.f32.mrb[13].mxu1 }
 0x6f5   :  { %v1269_v3 = vpop.f32.mrb[14].mxu1 }
 0x6f6   :  { %1272 = vst [vmem:[#allocation17] sm:$0xff] %v1267_v0  ;;  %v1599_v26 = vpop.f32.mrb[15].mxu1 }
 0x6f7   :  { %1921 = shalt.err (!%p1918_p6)
}
 0x6f8   :  { %s1922_s17 = scalar_lea.hbm %s2301_s10, 128 }
 0x6f9   :  { %p1923_p7 = scmp.ne.s32.totalorder %s2301_s10, %s1922_s17  ;;  %p1926_p8 = scmp.lt.u32.totalorder %s1922_s17, %s2301_s10 }
 0x6fb   :  { %p1928_p9 = pnand %p1926_p8, %p1923_p7 }
 0x6fd   :  { %1931 = shalt.err (!%p1928_p9)
}
 0x6fe   :  { %1282 = dma.vmem_to_hbm [thread:$0]  %s1280_s24, 128, %s2301_s10, [#allocation4]  }
 0x6ff   :  { %1942 = dma.done.wait [#allocation4], 128  }
 0x700   :  { %1943 = vsyncadd [#allocation4], 4294967168 }
 0x701   :  { %1286 = vsyncpa [#allocation3], 1 }
 0x702   :  { %1287 = vsyncpa [#allocation6], 1 }
 0x703   :  { %1288 = vsyncpa [#allocation9], 1 }
 0x704   :  { %1289 = vsyncpa [#allocation12], 1 }
 0x705   :  { %1290 = vsyncpa [#allocation15], 1 }
 0x706   :  { %1291 = vsyncpa [#allocation4], 1 }

</bundles_post_ra>
